<compile_context>
chip_gen: v5e
topology: v5e:2x2
jax: 0.10.0
libtpu: 0.0.40
codegen_flags: <defaults>
</compile_context>

<pallas_src>
import math
import functools

import jax
import jax.numpy as jnp
from jax.experimental import pallas as pl
from jax.experimental.pallas import tpu as pltpu


# --------------------------------------------------------------------------------------
# kernels
# --------------------------------------------------------------------------------------
def _kv_project_kernel(x_ref, wk_ref, bk_ref, wv_ref, bv_ref, k_ref, v_ref, *, H):
    """Project K and V for one (batch, seq-tile) block, writing head-major (H, TS, Dh)."""
    x = x_ref[0]                                   # (TS, E) bf16
    for h in range(H):                             # per-head dots: no relayout needed
        k = (jnp.dot(x, wk_ref[h], preferred_element_type=jnp.float32) + bk_ref[h])
        v = (jnp.dot(x, wv_ref[h], preferred_element_type=jnp.float32) + bv_ref[h])
        k_ref[0, h] = k.astype(k_ref.dtype)        # (TS, Dh)
        v_ref[0, h] = v.astype(v_ref.dtype)


def _encoder_layer_kernel(xq_ref, k_ref, v_ref,
                          wq_ref, bq_ref, wo_ref, bo_ref,
                          n1w_ref, n1b_ref, n2w_ref, n2b_ref,
                          w1_ref, b1_ref, w2_ref, b2_ref,
                          o_ref, *, S, TS, E, H, causal, eps=1e-5):
    Dh = E // H
    dt = xq_ref.dtype                              # bf16 fed to the MXU

    xq = xq_ref[0]                                 # (TS, E)   query rows / residual stream
    kh = k_ref[0]                                  # (H, S, Dh) precomputed, head-major
    vh = v_ref[0]                                  # (H, S, Dh)

    # ---- Q projection (1/sqrt(Dh) folded into wq/bq in prepare_params) ----------------
    q = (jnp.dot(xq, wq_ref[...], preferred_element_type=jnp.float32)
         + bq_ref[...]).astype(dt)                                     # (TS, E)
    qh = jnp.transpose(q.reshape(TS, H, Dh), (1, 0, 2))                # (H, TS, Dh)

    # ---- attention (f32 scores / softmax stats) ----------------------------------------
    s = jnp.einsum('hqd,hkd->hqk', qh, kh,
                   preferred_element_type=jnp.float32)                 # (H, TS, S) f32

    if causal:
        row0 = pl.program_id(1) * TS
        rows = row0 + jax.lax.broadcasted_iota(jnp.int32, (TS, S), 0)
        cols = jax.lax.broadcasted_iota(jnp.int32, (TS, S), 1)
        s = jnp.where((cols <= rows)[None, :, :], s, -1e30)

    s = s - jnp.max(s, axis=-1, keepdims=True)
    p = jnp.exp(s)
    l = jnp.sum(p, axis=-1, keepdims=True)                             # (H, TS, 1) f32
    a = jnp.einsum('hqk,hkd->hqd', p.astype(dt), vh,
                   preferred_element_type=jnp.float32)                 # (H, TS, Dh) f32
    a = a * pl.reciprocal(l, approx=True)                              # EUP, after P.V

    # ---- output projection folded per-head: sum_h a_h @ Wo_h (no head-concat relayout) -
    attn = jnp.einsum('hqd,hde->hqe', a.astype(dt), wo_ref[...],
                      preferred_element_type=jnp.float32)              # (H, TS, E) f32
    attn = jnp.sum(attn, axis=0) + bo_ref[...]                         # (TS, E) f32

    # TODO(synk): dropout1 / dropout / dropout2 are identity (inference mode).

    def layer_norm(y, w, b):                                           # f32 statistics
        mu = jnp.mean(y, axis=-1, keepdims=True)
        var = jnp.mean((y - mu) ** 2, axis=-1, keepdims=True)
        return (y - mu) * jax.lax.rsqrt(var + eps) * w + b

    y = layer_norm(xq.astype(jnp.float32) + attn, n1w_ref[...], n1b_ref[...])

    # ---- feed forward -------------------------------------------------------------------
    h1 = (jnp.dot(y.astype(dt), w1_ref[...], preferred_element_type=jnp.float32)
          + b1_ref[...])
    h1 = jnp.maximum(h1, 0.0)                                          # relu
    ff = (jnp.dot(h1.astype(dt), w2_ref[...], preferred_element_type=jnp.float32)
          + b2_ref[...])

    out = layer_norm(y + ff, n2w_ref[...], n2b_ref[...])
    o_ref[0] = out.astype(o_ref.dtype)


def _decoder_kernel(x_ref, w_ref, b_ref, o_ref):
    o_ref[0] = (jnp.dot(x_ref[0], w_ref[...], preferred_element_type=jnp.float32)
                + b_ref[...]).astype(o_ref.dtype)


# --------------------------------------------------------------------------------------
# spec / tiling / compiler-params helpers
# --------------------------------------------------------------------------------------
def _const_spec(shape, single_buffer):
    """BlockSpec for a grid-invariant (weight/bias) block; single-buffered when supported."""
    ndim = len(shape)
    index_map = lambda n, t: (0,) * ndim
    if single_buffer and hasattr(pl, "Buffered"):
        try:
            return pl.BlockSpec(shape, index_map, pipeline_mode=pl.Buffered(1))
        except TypeError:
            pass                       # older jax: no pipeline_mode kwarg
    return pl.BlockSpec(shape, index_map)


@functools.lru_cache(maxsize=1)
def _vmem_limit_bytes():
    # Generation-aware budget: ~75% of per-core VMEM, capped at 100 MiB.
    #   v5e/v6e (128 MiB physical) -> 96 MiB;  v7x (64 MiB physical) -> 48 MiB.
    default = 48 * 1024 * 1024
    try:
        info = pltpu.get_tpu_info()
        cap = getattr(info, "vmem_capacity_bytes", None)
        if not cap:
            return default
        return int(min(cap * 3 // 4, 100 * 1024 * 1024))
    except Exception:
        return default


def _compiler_params(num_grid_axes):
    return pltpu.CompilerParams(
        dimension_semantics=("parallel",) * num_grid_axes,
        vmem_limit_bytes=_vmem_limit_bytes(),
    )


def _pick_seq_tile(S, seq_tile=None):
    if seq_tile is not None:
        assert S % seq_tile == 0, "seq_tile must divide S"
        assert seq_tile == S or seq_tile % 16 == 0, "bf16 packing needs seq_tile % 16 == 0"
        return seq_tile
    if S <= 512:                         # whole sequence per tile (fills the MXU M dim)
        return S
    for t in (512, 256, 128, 64, 32, 16):
        if S % t == 0:
            return t
    # TODO(synk): pad S up to a multiple of 128 instead of falling back to one big tile.
    return S


def _pick_vocab_tile(T, vocab_tile=None):
    if vocab_tile is not None:
        assert T % vocab_tile == 0 and (vocab_tile == T or vocab_tile % 128 == 0)
        return vocab_tile
    if T <= 1024:
        return T
    for t in (1024, 512, 256, 128):
        if T % t == 0:
            return t
    return T


# --------------------------------------------------------------------------------------
# pallas_call wrappers
# --------------------------------------------------------------------------------------
def _kv_project(x, lp, *, nhead, seq_tile, single_buffer_weights=True):
    """x: (N, S, E) -> K, V in head-major layout (N, H, S, Dh)."""
    N, S, E = x.shape
    H = nhead
    Dh = E // H
    TS = seq_tile
    const = lambda shape: _const_spec(shape, single_buffer_weights)
    kv_block = pl.BlockSpec((1, H, TS, Dh), lambda n, t: (n, 0, t, 0))
    return pl.pallas_call(
        functools.partial(_kv_project_kernel, H=H),
        out_shape=(jax.ShapeDtypeStruct((N, H, S, Dh), x.dtype),
                   jax.ShapeDtypeStruct((N, H, S, Dh), x.dtype)),
        grid=(N, S // TS),
        in_specs=[
            pl.BlockSpec((1, TS, E), lambda n, t: (n, t, 0)),
            const((H, E, Dh)), const((H, 1, Dh)),           # W_k (head-major), b_k
            const((H, E, Dh)), const((H, 1, Dh)),           # W_v (head-major), b_v
        ],
        out_specs=(kv_block, kv_block),
        compiler_params=_compiler_params(2),
    )(x, lp["w_k"], lp["b_k"], lp["w_v"], lp["b_v"])


def _encoder_layer(x, k, v, lp, *, nhead, seq_tile, causal=True, single_buffer_weights=True):
    """x: (N, S, E); k/v: (N, H, S, Dh). One TransformerEncoderLayer (eval mode)."""
    N, S, E = x.shape
    H = nhead
    assert E % H == 0
    Dh = E // H
    FF = lp["w1"].shape[1]
    TS = seq_tile
    const = lambda shape: _const_spec(shape, single_buffer_weights)
    kernel = functools.partial(_encoder_layer_kernel,
                               S=S, TS=TS, E=E, H=H, causal=causal)
    return pl.pallas_call(
        kernel,
        out_shape=jax.ShapeDtypeStruct((N, S, E), x.dtype),
        grid=(N, S // TS),
        in_specs=[
            pl.BlockSpec((1, TS, E), lambda n, t: (n, t, 0)),      # query / residual rows
            pl.BlockSpec((1, H, S, Dh), lambda n, t: (n, 0, 0, 0)),  # precomputed K
            pl.BlockSpec((1, H, S, Dh), lambda n, t: (n, 0, 0, 0)),  # precomputed V
            const((E, E)), const((1, E)),                          # W_q (scaled), b_q
            const((H, Dh, E)), const((1, E)),                      # W_out (head-major), b_out
            const((1, E)), const((1, E)),                          # norm1 w, b
            const((1, E)), const((1, E)),                          # norm2 w, b
            const((E, FF)), const((1, FF)),                        # W1^T, b1
            const((FF, E)), const((1, E)),                         # W2^T, b2
        ],
        out_specs=pl.BlockSpec((1, TS, E), lambda n, t: (n, t, 0)),
        compiler_params=_compiler_params(2),
    )(x, k, v, lp["w_q"], lp["b_q"], lp["w_o"], lp["b_o"],
      lp["n1w"], lp["n1b"], lp["n2w"], lp["n2b"],
      lp["w1"], lp["b1"], lp["w2"], lp["b2"])


def _decoder(x, w, b, *, seq_tile, vocab_tile=None):
    """x: (N, S, E) bf16, w: (E, T) bf16, b: (1, T) f32 -> logits (N, S, T) f32."""
    N, S, E = x.shape
    T = w.shape[1]
    TS = seq_tile
    TT = _pick_vocab_tile(T, vocab_tile)
    return pl.pallas_call(
        _decoder_kernel,
        out_shape=jax.ShapeDtypeStruct((N, S, T), jnp.float32),
        grid=(N, S // TS, T // TT),
        in_specs=[pl.BlockSpec((1, TS, E), lambda n, s, t: (n, s, 0)),
                  pl.BlockSpec((E, TT), lambda n, s, t: (0, t)),
                  pl.BlockSpec((1, TT), lambda n, s, t: (0, t))],
        out_specs=pl.BlockSpec((1, TS, TT), lambda n, s, t: (n, s, t)),
        compiler_params=_compiler_params(3),
    )(x, w, b)


# --------------------------------------------------------------------------------------
# parameter preparation (one-time, outside the per-forward trace)
# --------------------------------------------------------------------------------------
def prepare_params(params, *, nhead, compute_dtype=jnp.bfloat16):
    """Transpose / split / scale-fold / bf16-cast all weights once."""
    layers = []
    for p in params["layers"]:
        E = p["in_proj_w"].shape[1]
        H = nhead
        Dh = E // H
        FF = p["linear1_w"].shape[0]
        scale = 1.0 / math.sqrt(Dh)
        in_w_t = p["in_proj_w"].T                                        # (E, 3E)
        layers.append({
            "w_q": (in_w_t[:, :E] * scale).astype(compute_dtype),                       # (E, E)
            "b_q": (p["in_proj_b"][:E] * scale).reshape(1, E).astype(jnp.float32),
            "w_k": in_w_t[:, E:2 * E].reshape(E, H, Dh).transpose(1, 0, 2)
                   .astype(compute_dtype),                                              # (H, E, Dh)
            "b_k": p["in_proj_b"][E:2 * E].reshape(H, 1, Dh).astype(jnp.float32),
            "w_v": in_w_t[:, 2 * E:].reshape(E, H, Dh).transpose(1, 0, 2)
                   .astype(compute_dtype),                                              # (H, E, Dh)
            "b_v": p["in_proj_b"][2 * E:].reshape(H, 1, Dh).astype(jnp.float32),
            "w_o": p["out_proj_w"].T.reshape(H, Dh, E).astype(compute_dtype),           # (H, Dh, E)
            "b_o": p["out_proj_b"].reshape(1, E).astype(jnp.float32),
            "w1": p["linear1_w"].T.astype(compute_dtype),                               # (E, FF)
            "b1": p["linear1_b"].reshape(1, FF).astype(jnp.float32),
            "w2": p["linear2_w"].T.astype(compute_dtype),                               # (FF, E)
            "b2": p["linear2_b"].reshape(1, E).astype(jnp.float32),
            "n1w": p["norm1_w"].reshape(1, E).astype(jnp.float32),
            "n1b": p["norm1_b"].reshape(1, E).astype(jnp.float32),
            "n2w": p["norm2_w"].reshape(1, E).astype(jnp.float32),
            "n2b": p["norm2_b"].reshape(1, E).astype(jnp.float32),
        })
    T = params["decoder_w"].shape[0]
    return {
        "layers": layers,
        "w_dec": params["decoder_w"].T.astype(compute_dtype),                           # (E, T)
        "b_dec": params["decoder_b"].reshape(1, T).astype(jnp.float32),
    }


# --------------------------------------------------------------------------------------
# forward
# --------------------------------------------------------------------------------------
def _positional_encoding(S, E):
    assert E % 2 == 0, "d_model must be even (as in the PyTorch PositionalEncoding)"
    position = jnp.arange(S, dtype=jnp.float32)[:, None]
    div_term = jnp.exp(jnp.arange(0, E, 2, dtype=jnp.float32)
                       * (-math.log(10000.0) / E))
    pe = jnp.zeros((S, E), jnp.float32)
    pe = pe.at[:, 0::2].set(jnp.sin(position * div_term))
    pe = pe.at[:, 1::2].set(jnp.cos(position * div_term))
    return pe


def transformer_forward(src, prepared, *, nhead, seq_tile=None, vocab_tile=None,
                        compute_dtype=jnp.bfloat16, single_buffer_weights=True):
    """src: (S, N, ninp) as in PyTorch; returns decoder output (S, N, ntoken) f32."""
    S, N, E = src.shape
    # src * sqrt(ninp) + positional encoding (dropout = identity, eval mode); bf16 activations.
    pe = _positional_encoding(S, E)
    x = src.astype(jnp.float32) * math.sqrt(E) + pe[:, None, :]
    x = jnp.transpose(x, (1, 0, 2)).astype(compute_dtype)              # (N, S, E)

    TS = _pick_seq_tile(S, seq_tile)
    for lp in prepared["layers"]:
        k, v = _kv_project(x, lp, nhead=nhead, seq_tile=TS,
                           single_buffer_weights=single_buffer_weights)
        x = _encoder_layer(x, k, v, lp, nhead=nhead, seq_tile=TS, causal=True,
                           single_buffer_weights=single_buffer_weights)

    out = _decoder(x, prepared["w_dec"], prepared["b_dec"],
                   seq_tile=TS, vocab_tile=vocab_tile)
    return jnp.transpose(out, (1, 0, 2))                               # (S, N, ntoken)


# --------------------------------------------------------------------------------------
# pure-JAX reference (mirrors the PyTorch eval-mode forward, f32)
# --------------------------------------------------------------------------------------
def _reference(src, params, *, nhead):
    S, N, E = src.shape
    H, Dh = nhead, E // nhead
    x = src.astype(jnp.float32) * math.sqrt(E) + _positional_encoding(S, E)[:, None, :]
    x = jnp.transpose(x, (1, 0, 2))                                    # (N, S, E)

    idx = jnp.arange(S)
    mask = jnp.where(idx[None, :] <= idx[:, None], 0.0, -jnp.inf)

    def ln(y, w, b):
        mu = jnp.mean(y, -1, keepdims=True)
        var = jnp.mean((y - mu) ** 2, -1, keepdims=True)
        return (y - mu) / jnp.sqrt(var + 1e-5) * w + b

    for p in params["layers"]:
        qkv = jnp.einsum("nse,fe->nsf", x, p["in_proj_w"]) + p["in_proj_b"]
        q, k, v = qkv[..., :E], qkv[..., E:2 * E], qkv[..., 2 * E:]
        split = lambda t: t.reshape(N, S, H, Dh).transpose(0, 2, 1, 3)
        q, k, v = split(q) / math.sqrt(Dh), split(k), split(v)
        s = jnp.einsum("nhqd,nhkd->nhqk", q, k) + mask
        pr = jax.nn.softmax(s, axis=-1)
        a = jnp.einsum("nhqk,nhkd->nhqd", pr, v).transpose(0, 2, 1, 3).reshape(N, S, E)
        attn = jnp.einsum("nse,fe->nsf", a, p["out_proj_w"]) + p["out_proj_b"]
        y = ln(x + attn, p["norm1_w"], p["norm1_b"])
        h = jnp.maximum(jnp.einsum("nse,fe->nsf", y, p["linear1_w"]) + p["linear1_b"], 0.0)
        ff = jnp.einsum("nsf,ef->nse", h, p["linear2_w"]) + p["linear2_b"]
        x = ln(y + ff, p["norm2_w"], p["norm2_b"])

    out = jnp.einsum("nse,te->nst", x, params["decoder_w"]) + params["decoder_b"]
    return jnp.transpose(out, (1, 0, 2))


# --------------------------------------------------------------------------------------
# parameters
# --------------------------------------------------------------------------------------
def make_params(key, *, ntoken, ninp, nhid, nhead, nlayers):
    del nhead  # only shapes matter here
    keys = jax.random.split(key, nlayers + 1)

    def xavier(k, shape):
        fan_out, fan_in = shape
        bound = math.sqrt(6.0 / (fan_in + fan_out))
        return jax.random.uniform(k, shape, jnp.float32, -bound, bound)

    layers = []
    for l in range(nlayers):
        ks = jax.random.split(keys[l], 6)
        layers.append({
            "in_proj_w": xavier(ks[0], (3 * ninp, ninp)),
            "in_proj_b": jnp.zeros((3 * ninp,), jnp.float32),
            "out_proj_w": xavier(ks[1], (ninp, ninp)),
            "out_proj_b": jnp.zeros((ninp,), jnp.float32),
            "linear1_w": xavier(ks[2], (nhid, ninp)),
            "linear1_b": 0.01 * jax.random.normal(ks[3], (nhid,), jnp.float32),
            "linear2_w": xavier(ks[4], (ninp, nhid)),
            "linear2_b": 0.01 * jax.random.normal(ks[5], (ninp,), jnp.float32),
            "norm1_w": jnp.ones((ninp,), jnp.float32),
            "norm1_b": jnp.zeros((ninp,), jnp.float32),
            "norm2_w": jnp.ones((ninp,), jnp.float32),
            "norm2_b": jnp.zeros((ninp,), jnp.float32),
        })
    dec_w = jax.random.uniform(keys[-1], (ntoken, ninp), jnp.float32, -0.1, 0.1)
    dec_b = jnp.zeros((ntoken,), jnp.float32)
    return {"layers": layers, "decoder_w": dec_w, "decoder_b": dec_b}


# --------------------------------------------------------------------------------------
if __name__ == "__main__":
    # TPU-friendly shapes: 128/256-aligned lane dims, head_dim = 128.
    S, N = 64, 2
    NTOKEN, NINP, NHID, NHEAD, NLAYERS = 256, 256, 256, 2, 2
    SEQ_TILE = 32          # 2 query tiles per batch row -> exercises the tiled causal path

    key = jax.random.PRNGKey(0)
    k_src, k_par = jax.random.split(key)
    # Modest input scale keeps attention logits O(1), so the bf16 kernel vs f32 reference
    # comparison is meaningful (the module's own sqrt(ninp) scaling is still applied).
    src = 0.1 * jax.random.normal(k_src, (S, N, NINP), jnp.float32)
    params = make_params(k_par, ntoken=NTOKEN, ninp=NINP, nhid=NHID,
                         nhead=NHEAD, nlayers=NLAYERS)
    prepared = prepare_params(params, nhead=NHEAD)

    def run(single_buffer_weights):
        out = transformer_forward(src, prepared, nhead=NHEAD, seq_tile=SEQ_TILE,
                                  single_buffer_weights=single_buffer_weights)
        return jax.block_until_ready(out)

    try:
        out = run(True)
    except Exception:
        # TODO(synk): this jax build rejects pl.Buffered(1) single-buffering; use defaults.
        out = run(False)

    ref = _reference(src, params, nhead=NHEAD)
    assert out.shape == (S, N, NTOKEN)
    max_err = float(jnp.max(jnp.abs(out - ref)))
    # bf16 MXU operands + approx softmax reciprocal -> tolerance loosened vs f32 reference.
    assert jnp.allclose(out, ref, atol=1e-1, rtol=5e-2), f"mismatch vs reference ({max_err})"

    print("KERNEL_OK")
</pallas_src>

<mosaic_0001>
module attributes {stable_mosaic.version = 11 : i64} {
  func.func @_kv_project_kernel(%arg0: i32, %arg1: i32, %arg2: memref<1x32x256xbf16, #tpu.memory_space<vmem>>, %arg3: memref<2x256x128xbf16, #tpu.memory_space<vmem>>, %arg4: memref<2x1x128xf32, #tpu.memory_space<vmem>>, %arg5: memref<2x256x128xbf16, #tpu.memory_space<vmem>>, %arg6: memref<2x1x128xf32, #tpu.memory_space<vmem>>, %arg7: memref<1x2x32x128xbf16, #tpu.memory_space<vmem>>, %arg8: memref<1x2x32x128xbf16, #tpu.memory_space<vmem>>) attributes {dimension_semantics = [#tpu.dimension_semantics<parallel>, #tpu.dimension_semantics<parallel>], iteration_bounds = array<i64: 2, 2>, scalar_prefetch = 0 : i64, scratch_operands = 0 : i64, tpu.core_type = #tpu.core_type<tc>, window_params = [{transform_indices = @transform_0, window_bounds = array<i64: 1, 32, 256>}, {pipeline_mode = #tpu.pipeline_mode<synchronous>, transform_indices = @transform_1, window_bounds = array<i64: 2, 256, 128>}, {pipeline_mode = #tpu.pipeline_mode<synchronous>, transform_indices = @transform_2, window_bounds = array<i64: 2, 1, 128>}, {pipeline_mode = #tpu.pipeline_mode<synchronous>, transform_indices = @transform_3, window_bounds = array<i64: 2, 256, 128>}, {pipeline_mode = #tpu.pipeline_mode<synchronous>, transform_indices = @transform_4, window_bounds = array<i64: 2, 1, 128>}, {transform_indices = @transform_5, window_bounds = array<i64: 1, 2, 32, 128>}, {transform_indices = @transform_6, window_bounds = array<i64: 1, 2, 32, 128>}]} {
    %c0 = arith.constant 0 : index
    %c0_0 = arith.constant 0 : index
    %c0_1 = arith.constant 0 : index
    %0 = vector.load %arg2[%c0, %c0_0, %c0_1] : memref<1x32x256xbf16, #tpu.memory_space<vmem>>, vector<1x32x256xbf16>
    %1 = vector.shape_cast %0 : vector<1x32x256xbf16> to vector<32x256xbf16>
    %c0_2 = arith.constant 0 : index
    %c0_3 = arith.constant 0 : index
    %c0_4 = arith.constant 0 : index
    %2 = vector.load %arg3[%c0_2, %c0_3, %c0_4] : memref<2x256x128xbf16, #tpu.memory_space<vmem>>, vector<1x256x128xbf16>
    %3 = vector.shape_cast %2 : vector<1x256x128xbf16> to vector<256x128xbf16>
    %cst = arith.constant dense<0.000000e+00> : vector<32x128xf32>
    %4 = tpu.matmul %1, %3, %cst {dimension_numbers = #tpu.dot_dimension_numbers<[1], [0], [0], [1], [0, 0, 1, 1], [], []>} : vector<32x256xbf16>, vector<256x128xbf16>, vector<32x128xf32> -> vector<32x128xf32>
    %c0_5 = arith.constant 0 : index
    %c0_6 = arith.constant 0 : index
    %c0_7 = arith.constant 0 : index
    %5 = vector.load %arg4[%c0_5, %c0_6, %c0_7] : memref<2x1x128xf32, #tpu.memory_space<vmem>>, vector<1x1x128xf32>
    %6 = vector.shape_cast %5 : vector<1x1x128xf32> to vector<1x128xf32>
    %7 = vector.broadcast %6 : vector<1x128xf32> to vector<32x128xf32>
    %8 = arith.addf %4, %7 : vector<32x128xf32>
    %c0_8 = arith.constant 0 : index
    %c0_9 = arith.constant 0 : index
    %c0_10 = arith.constant 0 : index
    %9 = vector.load %arg5[%c0_8, %c0_9, %c0_10] : memref<2x256x128xbf16, #tpu.memory_space<vmem>>, vector<1x256x128xbf16>
    %10 = vector.shape_cast %9 : vector<1x256x128xbf16> to vector<256x128xbf16>
    %cst_11 = arith.constant dense<0.000000e+00> : vector<32x128xf32>
    %11 = tpu.matmul %1, %10, %cst_11 {dimension_numbers = #tpu.dot_dimension_numbers<[1], [0], [0], [1], [0, 0, 1, 1], [], []>} : vector<32x256xbf16>, vector<256x128xbf16>, vector<32x128xf32> -> vector<32x128xf32>
    %c0_12 = arith.constant 0 : index
    %c0_13 = arith.constant 0 : index
    %c0_14 = arith.constant 0 : index
    %12 = vector.load %arg6[%c0_12, %c0_13, %c0_14] : memref<2x1x128xf32, #tpu.memory_space<vmem>>, vector<1x1x128xf32>
    %13 = vector.shape_cast %12 : vector<1x1x128xf32> to vector<1x128xf32>
    %14 = vector.broadcast %13 : vector<1x128xf32> to vector<32x128xf32>
    %15 = arith.addf %11, %14 : vector<32x128xf32>
    %16 = arith.truncf %8 : vector<32x128xf32> to vector<32x128xbf16>
    %c0_15 = arith.constant 0 : index
    %c0_16 = arith.constant 0 : index
    %c0_17 = arith.constant 0 : index
    %c0_18 = arith.constant 0 : index
    %17 = vector.load %arg7[%c0_15, %c0_16, %c0_17, %c0_18] : memref<1x2x32x128xbf16, #tpu.memory_space<vmem>>, vector<1x1x32x128xbf16>
    %18 = vector.shape_cast %17 : vector<1x1x32x128xbf16> to vector<32x128xbf16>
    %19 = vector.shape_cast %16 : vector<32x128xbf16> to vector<1x1x32x128xbf16>
    tpu.vector_store %arg7[%c0_15, %c0_16, %c0_17, %c0_18], %19 {strides = array<i32>} : memref<1x2x32x128xbf16, #tpu.memory_space<vmem>>, vector<1x1x32x128xbf16>,
    %20 = arith.truncf %15 : vector<32x128xf32> to vector<32x128xbf16>
    %c0_19 = arith.constant 0 : index
    %c0_20 = arith.constant 0 : index
    %c0_21 = arith.constant 0 : index
    %c0_22 = arith.constant 0 : index
    %21 = vector.load %arg8[%c0_19, %c0_20, %c0_21, %c0_22] : memref<1x2x32x128xbf16, #tpu.memory_space<vmem>>, vector<1x1x32x128xbf16>
    %22 = vector.shape_cast %21 : vector<1x1x32x128xbf16> to vector<32x128xbf16>
    %23 = vector.shape_cast %20 : vector<32x128xbf16> to vector<1x1x32x128xbf16>
    tpu.vector_store %arg8[%c0_19, %c0_20, %c0_21, %c0_22], %23 {strides = array<i32>} : memref<1x2x32x128xbf16, #tpu.memory_space<vmem>>, vector<1x1x32x128xbf16>,
    %c1 = arith.constant 1 : index
    %c0_23 = arith.constant 0 : index
    %c0_24 = arith.constant 0 : index
    %24 = vector.load %arg3[%c1, %c0_23, %c0_24] : memref<2x256x128xbf16, #tpu.memory_space<vmem>>, vector<1x256x128xbf16>
    %25 = vector.shape_cast %24 : vector<1x256x128xbf16> to vector<256x128xbf16>
    %cst_25 = arith.constant dense<0.000000e+00> : vector<32x128xf32>
    %26 = tpu.matmul %1, %25, %cst_25 {dimension_numbers = #tpu.dot_dimension_numbers<[1], [0], [0], [1], [0, 0, 1, 1], [], []>} : vector<32x256xbf16>, vector<256x128xbf16>, vector<32x128xf32> -> vector<32x128xf32>
    %c1_26 = arith.constant 1 : index
    %c0_27 = arith.constant 0 : index
    %c0_28 = arith.constant 0 : index
    %27 = vector.load %arg4[%c1_26, %c0_27, %c0_28] : memref<2x1x128xf32, #tpu.memory_space<vmem>>, vector<1x1x128xf32>
    %28 = vector.shape_cast %27 : vector<1x1x128xf32> to vector<1x128xf32>
    %29 = vector.broadcast %28 : vector<1x128xf32> to vector<32x128xf32>
    %30 = arith.addf %26, %29 : vector<32x128xf32>
    %c1_29 = arith.constant 1 : index
    %c0_30 = arith.constant 0 : index
    %c0_31 = arith.constant 0 : index
    %31 = vector.load %arg5[%c1_29, %c0_30, %c0_31] : memref<2x256x128xbf16, #tpu.memory_space<vmem>>, vector<1x256x128xbf16>
    %32 = vector.shape_cast %31 : vector<1x256x128xbf16> to vector<256x128xbf16>
    %cst_32 = arith.constant dense<0.000000e+00> : vector<32x128xf32>
    %33 = tpu.matmul %1, %32, %cst_32 {dimension_numbers = #tpu.dot_dimension_numbers<[1], [0], [0], [1], [0, 0, 1, 1], [], []>} : vector<32x256xbf16>, vector<256x128xbf16>, vector<32x128xf32> -> vector<32x128xf32>
    %c1_33 = arith.constant 1 : index
    %c0_34 = arith.constant 0 : index
    %c0_35 = arith.constant 0 : index
    %34 = vector.load %arg6[%c1_33, %c0_34, %c0_35] : memref<2x1x128xf32, #tpu.memory_space<vmem>>, vector<1x1x128xf32>
    %35 = vector.shape_cast %34 : vector<1x1x128xf32> to vector<1x128xf32>
    %36 = vector.broadcast %35 : vector<1x128xf32> to vector<32x128xf32>
    %37 = arith.addf %33, %36 : vector<32x128xf32>
    %38 = arith.truncf %30 : vector<32x128xf32> to vector<32x128xbf16>
    %c0_36 = arith.constant 0 : index
    %c1_37 = arith.constant 1 : index
    %c0_38 = arith.constant 0 : index
    %c0_39 = arith.constant 0 : index
    %39 = vector.load %arg7[%c0_36, %c1_37, %c0_38, %c0_39] : memref<1x2x32x128xbf16, #tpu.memory_space<vmem>>, vector<1x1x32x128xbf16>
    %40 = vector.shape_cast %39 : vector<1x1x32x128xbf16> to vector<32x128xbf16>
    %41 = vector.shape_cast %38 : vector<32x128xbf16> to vector<1x1x32x128xbf16>
    tpu.vector_store %arg7[%c0_36, %c1_37, %c0_38, %c0_39], %41 {strides = array<i32>} : memref<1x2x32x128xbf16, #tpu.memory_space<vmem>>, vector<1x1x32x128xbf16>,
    %42 = arith.truncf %37 : vector<32x128xf32> to vector<32x128xbf16>
    %c0_40 = arith.constant 0 : index
    %c1_41 = arith.constant 1 : index
    %c0_42 = arith.constant 0 : index
    %c0_43 = arith.constant 0 : index
    %43 = vector.load %arg8[%c0_40, %c1_41, %c0_42, %c0_43] : memref<1x2x32x128xbf16, #tpu.memory_space<vmem>>, vector<1x1x32x128xbf16>
    %44 = vector.shape_cast %43 : vector<1x1x32x128xbf16> to vector<32x128xbf16>
    %45 = vector.shape_cast %42 : vector<32x128xbf16> to vector<1x1x32x128xbf16>
    tpu.vector_store %arg8[%c0_40, %c1_41, %c0_42, %c0_43], %45 {strides = array<i32>} : memref<1x2x32x128xbf16, #tpu.memory_space<vmem>>, vector<1x1x32x128xbf16>,
    return
  }
  func.func @transform_0(%arg0: i32, %arg1: i32) -> (i32, i32, i32) {
    %c0_i32 = arith.constant 0 : i32
    %c0_i32_0 = arith.constant 0 : i32
    return %arg0, %arg1, %c0_i32 : i32, i32, i32
  }
  func.func @transform_1(%arg0: i32, %arg1: i32) -> (i32, i32, i32) {
    %c0_i32 = arith.constant 0 : i32
    %c0_i32_0 = arith.constant 0 : i32
    %c0_i32_1 = arith.constant 0 : i32
    %c0_i32_2 = arith.constant 0 : i32
    return %c0_i32, %c0_i32_0, %c0_i32_1 : i32, i32, i32
  }
  func.func @transform_2(%arg0: i32, %arg1: i32) -> (i32, i32, i32) {
    %c0_i32 = arith.constant 0 : i32
    %c0_i32_0 = arith.constant 0 : i32
    %c0_i32_1 = arith.constant 0 : i32
    %c0_i32_2 = arith.constant 0 : i32
    return %c0_i32, %c0_i32_0, %c0_i32_1 : i32, i32, i32
  }
  func.func @transform_3(%arg0: i32, %arg1: i32) -> (i32, i32, i32) {
    %c0_i32 = arith.constant 0 : i32
    %c0_i32_0 = arith.constant 0 : i32
    %c0_i32_1 = arith.constant 0 : i32
    %c0_i32_2 = arith.constant 0 : i32
    return %c0_i32, %c0_i32_0, %c0_i32_1 : i32, i32, i32
  }
  func.func @transform_4(%arg0: i32, %arg1: i32) -> (i32, i32, i32) {
    %c0_i32 = arith.constant 0 : i32
    %c0_i32_0 = arith.constant 0 : i32
    %c0_i32_1 = arith.constant 0 : i32
    %c0_i32_2 = arith.constant 0 : i32
    return %c0_i32, %c0_i32_0, %c0_i32_1 : i32, i32, i32
  }
  func.func @transform_5(%arg0: i32, %arg1: i32) -> (i32, i32, i32, i32) {
    %c0_i32 = arith.constant 0 : i32
    %c0_i32_0 = arith.constant 0 : i32
    %c0_i32_1 = arith.constant 0 : i32
    return %arg0, %c0_i32, %arg1, %c0_i32_0 : i32, i32, i32, i32
  }
  func.func @transform_6(%arg0: i32, %arg1: i32) -> (i32, i32, i32, i32) {
    %c0_i32 = arith.constant 0 : i32
    %c0_i32_0 = arith.constant 0 : i32
    %c0_i32_1 = arith.constant 0 : i32
    return %arg0, %c0_i32, %arg1, %c0_i32_0 : i32, i32, i32, i32
  }
}

module attributes {stable_mosaic.version = 11 : i64} {
  func.func @_kv_project_kernel(%arg0: i32, %arg1: i32, %arg2: memref<1x32x256xbf16, #tpu.memory_space<vmem>>, %arg3: memref<2x256x128xbf16, #tpu.memory_space<vmem>>, %arg4: memref<2x1x128xf32, #tpu.memory_space<vmem>>, %arg5: memref<2x256x128xbf16, #tpu.memory_space<vmem>>, %arg6: memref<2x1x128xf32, #tpu.memory_space<vmem>>, %arg7: memref<1x2x32x128xbf16, #tpu.memory_space<vmem>>, %arg8: memref<1x2x32x128xbf16, #tpu.memory_space<vmem>>) attributes {dimension_semantics = [#tpu.dimension_semantics<parallel>, #tpu.dimension_semantics<parallel>], iteration_bounds = array<i64: 2, 2>, scalar_prefetch = 0 : i64, scratch_operands = 0 : i64, tpu.core_type = #tpu.core_type<tc>, window_params = [{transform_indices = @transform_0, window_bounds = array<i64: 1, 32, 256>}, {pipeline_mode = #tpu.pipeline_mode<synchronous>, transform_indices = @transform_1, window_bounds = array<i64: 2, 256, 128>}, {pipeline_mode = #tpu.pipeline_mode<synchronous>, transform_indices = @transform_2, window_bounds = array<i64: 2, 1, 128>}, {pipeline_mode = #tpu.pipeline_mode<synchronous>, transform_indices = @transform_3, window_bounds = array<i64: 2, 256, 128>}, {pipeline_mode = #tpu.pipeline_mode<synchronous>, transform_indices = @transform_4, window_bounds = array<i64: 2, 1, 128>}, {transform_indices = @transform_5, window_bounds = array<i64: 1, 2, 32, 128>}, {transform_indices = @transform_6, window_bounds = array<i64: 1, 2, 32, 128>}]} {
    %c0 = arith.constant 0 : index
    %c0_0 = arith.constant 0 : index
    %c0_1 = arith.constant 0 : index
    %0 = vector.load %arg2[%c0, %c0_0, %c0_1] : memref<1x32x256xbf16, #tpu.memory_space<vmem>>, vector<1x32x256xbf16>
    %1 = vector.shape_cast %0 : vector<1x32x256xbf16> to vector<32x256xbf16>
    %c0_2 = arith.constant 0 : index
    %c0_3 = arith.constant 0 : index
    %c0_4 = arith.constant 0 : index
    %2 = vector.load %arg3[%c0_2, %c0_3, %c0_4] : memref<2x256x128xbf16, #tpu.memory_space<vmem>>, vector<1x256x128xbf16>
    %3 = vector.shape_cast %2 : vector<1x256x128xbf16> to vector<256x128xbf16>
    %cst = arith.constant dense<0.000000e+00> : vector<32x128xf32>
    %4 = tpu.matmul %1, %3, %cst {dimension_numbers = #tpu.dot_dimension_numbers<[1], [0], [0], [1], [0, 0, 1, 1], [], []>} : vector<32x256xbf16>, vector<256x128xbf16>, vector<32x128xf32> -> vector<32x128xf32>
    %c0_5 = arith.constant 0 : index
    %c0_6 = arith.constant 0 : index
    %c0_7 = arith.constant 0 : index
    %5 = vector.load %arg4[%c0_5, %c0_6, %c0_7] : memref<2x1x128xf32, #tpu.memory_space<vmem>>, vector<1x1x128xf32>
    %6 = vector.shape_cast %5 : vector<1x1x128xf32> to vector<1x128xf32>
    %7 = vector.broadcast %6 : vector<1x128xf32> to vector<32x128xf32>
    %8 = arith.addf %4, %7 : vector<32x128xf32>
    %c0_8 = arith.constant 0 : index
    %c0_9 = arith.constant 0 : index
    %c0_10 = arith.constant 0 : index
    %9 = vector.load %arg5[%c0_8, %c0_9, %c0_10] : memref<2x256x128xbf16, #tpu.memory_space<vmem>>, vector<1x256x128xbf16>
    %10 = vector.shape_cast %9 : vector<1x256x128xbf16> to vector<256x128xbf16>
    %cst_11 = arith.constant dense<0.000000e+00> : vector<32x128xf32>
    %11 = tpu.matmul %1, %10, %cst_11 {dimension_numbers = #tpu.dot_dimension_numbers<[1], [0], [0], [1], [0, 0, 1, 1], [], []>} : vector<32x256xbf16>, vector<256x128xbf16>, vector<32x128xf32> -> vector<32x128xf32>
    %c0_12 = arith.constant 0 : index
    %c0_13 = arith.constant 0 : index
    %c0_14 = arith.constant 0 : index
    %12 = vector.load %arg6[%c0_12, %c0_13, %c0_14] : memref<2x1x128xf32, #tpu.memory_space<vmem>>, vector<1x1x128xf32>
    %13 = vector.shape_cast %12 : vector<1x1x128xf32> to vector<1x128xf32>
    %14 = vector.broadcast %13 : vector<1x128xf32> to vector<32x128xf32>
    %15 = arith.addf %11, %14 : vector<32x128xf32>
    %16 = arith.truncf %8 : vector<32x128xf32> to vector<32x128xbf16>
    %c0_15 = arith.constant 0 : index
    %c0_16 = arith.constant 0 : index
    %c0_17 = arith.constant 0 : index
    %c0_18 = arith.constant 0 : index
    %17 = vector.load %arg7[%c0_15, %c0_16, %c0_17, %c0_18] : memref<1x2x32x128xbf16, #tpu.memory_space<vmem>>, vector<1x1x32x128xbf16>
    %18 = vector.shape_cast %17 : vector<1x1x32x128xbf16> to vector<32x128xbf16>
    %19 = vector.shape_cast %16 : vector<32x128xbf16> to vector<1x1x32x128xbf16>
    tpu.vector_store %arg7[%c0_15, %c0_16, %c0_17, %c0_18], %19 {strides = array<i32>} : memref<1x2x32x128xbf16, #tpu.memory_space<vmem>>, vector<1x1x32x128xbf16>,
    %20 = arith.truncf %15 : vector<32x128xf32> to vector<32x128xbf16>
    %c0_19 = arith.constant 0 : index
    %c0_20 = arith.constant 0 : index
    %c0_21 = arith.constant 0 : index
    %c0_22 = arith.constant 0 : index
    %21 = vector.load %arg8[%c0_19, %c0_20, %c0_21, %c0_22] : memref<1x2x32x128xbf16, #tpu.memory_space<vmem>>, vector<1x1x32x128xbf16>
    %22 = vector.shape_cast %21 : vector<1x1x32x128xbf16> to vector<32x128xbf16>
    %23 = vector.shape_cast %20 : vector<32x128xbf16> to vector<1x1x32x128xbf16>
    tpu.vector_store %arg8[%c0_19, %c0_20, %c0_21, %c0_22], %23 {strides = array<i32>} : memref<1x2x32x128xbf16, #tpu.memory_space<vmem>>, vector<1x1x32x128xbf16>,
    %c1 = arith.constant 1 : index
    %c0_23 = arith.constant 0 : index
    %c0_24 = arith.constant 0 : index
    %24 = vector.load %arg3[%c1, %c0_23, %c0_24] : memref<2x256x128xbf16, #tpu.memory_space<vmem>>, vector<1x256x128xbf16>
    %25 = vector.shape_cast %24 : vector<1x256x128xbf16> to vector<256x128xbf16>
    %cst_25 = arith.constant dense<0.000000e+00> : vector<32x128xf32>
    %26 = tpu.matmul %1, %25, %cst_25 {dimension_numbers = #tpu.dot_dimension_numbers<[1], [0], [0], [1], [0, 0, 1, 1], [], []>} : vector<32x256xbf16>, vector<256x128xbf16>, vector<32x128xf32> -> vector<32x128xf32>
    %c1_26 = arith.constant 1 : index
    %c0_27 = arith.constant 0 : index
    %c0_28 = arith.constant 0 : index
    %27 = vector.load %arg4[%c1_26, %c0_27, %c0_28] : memref<2x1x128xf32, #tpu.memory_space<vmem>>, vector<1x1x128xf32>
    %28 = vector.shape_cast %27 : vector<1x1x128xf32> to vector<1x128xf32>
    %29 = vector.broadcast %28 : vector<1x128xf32> to vector<32x128xf32>
    %30 = arith.addf %26, %29 : vector<32x128xf32>
    %c1_29 = arith.constant 1 : index
    %c0_30 = arith.constant 0 : index
    %c0_31 = arith.constant 0 : index
    %31 = vector.load %arg5[%c1_29, %c0_30, %c0_31] : memref<2x256x128xbf16, #tpu.memory_space<vmem>>, vector<1x256x128xbf16>
    %32 = vector.shape_cast %31 : vector<1x256x128xbf16> to vector<256x128xbf16>
    %cst_32 = arith.constant dense<0.000000e+00> : vector<32x128xf32>
    %33 = tpu.matmul %1, %32, %cst_32 {dimension_numbers = #tpu.dot_dimension_numbers<[1], [0], [0], [1], [0, 0, 1, 1], [], []>} : vector<32x256xbf16>, vector<256x128xbf16>, vector<32x128xf32> -> vector<32x128xf32>
    %c1_33 = arith.constant 1 : index
    %c0_34 = arith.constant 0 : index
    %c0_35 = arith.constant 0 : index
    %34 = vector.load %arg6[%c1_33, %c0_34, %c0_35] : memref<2x1x128xf32, #tpu.memory_space<vmem>>, vector<1x1x128xf32>
    %35 = vector.shape_cast %34 : vector<1x1x128xf32> to vector<1x128xf32>
    %36 = vector.broadcast %35 : vector<1x128xf32> to vector<32x128xf32>
    %37 = arith.addf %33, %36 : vector<32x128xf32>
    %38 = arith.truncf %30 : vector<32x128xf32> to vector<32x128xbf16>
    %c0_36 = arith.constant 0 : index
    %c1_37 = arith.constant 1 : index
    %c0_38 = arith.constant 0 : index
    %c0_39 = arith.constant 0 : index
    %39 = vector.load %arg7[%c0_36, %c1_37, %c0_38, %c0_39] : memref<1x2x32x128xbf16, #tpu.memory_space<vmem>>, vector<1x1x32x128xbf16>
    %40 = vector.shape_cast %39 : vector<1x1x32x128xbf16> to vector<32x128xbf16>
    %41 = vector.shape_cast %38 : vector<32x128xbf16> to vector<1x1x32x128xbf16>
    tpu.vector_store %arg7[%c0_36, %c1_37, %c0_38, %c0_39], %41 {strides = array<i32>} : memref<1x2x32x128xbf16, #tpu.memory_space<vmem>>, vector<1x1x32x128xbf16>,
    %42 = arith.truncf %37 : vector<32x128xf32> to vector<32x128xbf16>
    %c0_40 = arith.constant 0 : index
    %c1_41 = arith.constant 1 : index
    %c0_42 = arith.constant 0 : index
    %c0_43 = arith.constant 0 : index
    %43 = vector.load %arg8[%c0_40, %c1_41, %c0_42, %c0_43] : memref<1x2x32x128xbf16, #tpu.memory_space<vmem>>, vector<1x1x32x128xbf16>
    %44 = vector.shape_cast %43 : vector<1x1x32x128xbf16> to vector<32x128xbf16>
    %45 = vector.shape_cast %42 : vector<32x128xbf16> to vector<1x1x32x128xbf16>
    tpu.vector_store %arg8[%c0_40, %c1_41, %c0_42, %c0_43], %45 {strides = array<i32>} : memref<1x2x32x128xbf16, #tpu.memory_space<vmem>>, vector<1x1x32x128xbf16>,
    return
  }
  func.func @transform_0(%arg0: i32, %arg1: i32) -> (i32, i32, i32) {
    %c0_i32 = arith.constant 0 : i32
    %c0_i32_0 = arith.constant 0 : i32
    return %arg0, %arg1, %c0_i32 : i32, i32, i32
  }
  func.func @transform_1(%arg0: i32, %arg1: i32) -> (i32, i32, i32) {
    %c0_i32 = arith.constant 0 : i32
    %c0_i32_0 = arith.constant 0 : i32
    %c0_i32_1 = arith.constant 0 : i32
    %c0_i32_2 = arith.constant 0 : i32
    return %c0_i32, %c0_i32_0, %c0_i32_1 : i32, i32, i32
  }
  func.func @transform_2(%arg0: i32, %arg1: i32) -> (i32, i32, i32) {
    %c0_i32 = arith.constant 0 : i32
    %c0_i32_0 = arith.constant 0 : i32
    %c0_i32_1 = arith.constant 0 : i32
    %c0_i32_2 = arith.constant 0 : i32
    return %c0_i32, %c0_i32_0, %c0_i32_1 : i32, i32, i32
  }
  func.func @transform_3(%arg0: i32, %arg1: i32) -> (i32, i32, i32) {
    %c0_i32 = arith.constant 0 : i32
    %c0_i32_0 = arith.constant 0 : i32
    %c0_i32_1 = arith.constant 0 : i32
    %c0_i32_2 = arith.constant 0 : i32
    return %c0_i32, %c0_i32_0, %c0_i32_1 : i32, i32, i32
  }
  func.func @transform_4(%arg0: i32, %arg1: i32) -> (i32, i32, i32) {
    %c0_i32 = arith.constant 0 : i32
    %c0_i32_0 = arith.constant 0 : i32
    %c0_i32_1 = arith.constant 0 : i32
    %c0_i32_2 = arith.constant 0 : i32
    return %c0_i32, %c0_i32_0, %c0_i32_1 : i32, i32, i32
  }
  func.func @transform_5(%arg0: i32, %arg1: i32) -> (i32, i32, i32, i32) {
    %c0_i32 = arith.constant 0 : i32
    %c0_i32_0 = arith.constant 0 : i32
    %c0_i32_1 = arith.constant 0 : i32
    return %arg0, %c0_i32, %arg1, %c0_i32_0 : i32, i32, i32, i32
  }
  func.func @transform_6(%arg0: i32, %arg1: i32) -> (i32, i32, i32, i32) {
    %c0_i32 = arith.constant 0 : i32
    %c0_i32_0 = arith.constant 0 : i32
    %c0_i32_1 = arith.constant 0 : i32
    return %arg0, %c0_i32, %arg1, %c0_i32_0 : i32, i32, i32, i32
  }
}

</mosaic_0001>

<bundles_post_ra>
// kernel: tpu_custom_call.1
= control target key start
LH: loop header
LB: loop body
LE: loop exit
PB: predicated region body
PF: predicated region fallthrough
CT: control target
= control target key end

     0   :  { %s2439_s0 = inlined_call_operand.hbm [shape: bf16[2,64,256], index: 0, kind: input, shape index: {}]   ;;  %s2440_s1 = inlined_call_operand.hbm [shape: bf16[2,256,128], index: 1, kind: input, shape index: {}]   ;;  %s2441_s2 = inlined_call_operand.hbm [shape: f32[2,1,128], index: 2, kind: input, shape index: {}]   ;;  %s2442_s3 = inlined_call_operand.hbm [shape: bf16[2,256,128], index: 3, kind: input, shape index: {}]   ;;  %s2443_s4 = inlined_call_operand.vmem [shape: f32[2,1,128], index: 4, kind: input, shape index: {}]   ;;  %s2444_s5 = inlined_call_operand.hbm [shape: bf16[2,2,64,128], index: 5, kind: output, shape index: {0}]   ;;  %s2445_s6 = inlined_call_operand.hbm [shape: bf16[2,2,64,128], index: 6, kind: output, shape index: {1}]  }
   0x1   :  { %2450 = sst [smem:[#allocation26_spill]] %s2440_s1 }
   0x2   :  { %2451 = sst [smem:[#allocation27_spill]] %s2441_s2 }
   0x3   :  { %2452 = sst [smem:[#allocation28_spill]] %s2442_s3 }
   0x4   :  { %2453 = sst [smem:[#allocation29_spill]] %s2444_s5 }
   0x5   :  { %2454 = sst [smem:[#allocation30_spill]] %s2445_s6 }
   0x6   :  { %12 = vsyncpa [#allocation3], 0 }
   0x7   :  { %14 = vsyncpa [#allocation3 + $0x1], 0 }
   0x8   :  { %15 = vsyncpa [#allocation6], 0 }
   0x9   :  { %16 = vsyncpa [#allocation9], 0 }
   0xa   :  { %17 = vsyncpa [#allocation4], 0 }
   0xb   :  { %19 = vsyncpa [#allocation4 + $0x1], 0 }
   0xc   :  { %20 = vsyncpa [#allocation12], 0 }
   0xd   :  { %22 = vsyncpa [#allocation12 + $0x1], 0  ;;  %s2175_s21 = smov 0   ;;  %s2177_s22 = smov 0  }
   0xe   :  { %s2179_s23 = smov 0   ;;  %s2181_s24 = smov 0  }
   0xf   :  { %s2183_s25 = smov 0   ;;  %s2185_s26 = smov 0  }
  0x10   :  { %s2187_s27 = smov 0   ;;  %s2189_s28 = smov 0  }
  0x11 LB: > { %2455 = sst [smem:[#allocation22_spill]] %s2089_s21  ;;  %s1342_s29 = sadd.s32 4294967295, %s2117_s28   ;;  %s2117_s28 = sphi %s2189_s28, %s28_s28   ;;  %s2113_s27 = sphi %s2187_s27, %s2480_s27   ;;  %s2109_s26 = sphi %s2185_s26, %s2475_s26   ;;  %s2105_s25 = sphi %s2183_s25, %s2479_s25   ;;  %s2101_s24 = sphi %s2181_s24, %s2474_s24   ;;  %s2097_s23 = sphi %s2179_s23, %s2478_s23   ;;  %s2093_s22 = sphi %s2177_s22, %s2477_s22   ;;  %s2089_s21 = sphi %s2175_s21, %s2476_s21  }
  0x12   : > { %2456 = sst [smem:[#allocation23_spill]] %s2109_s26  ;;  %s1343_s30 = sadd.s32 4294967294, %s2117_s28  }
  0x13   : > { %p62_p0 = scmp.ne.s32.totalorder %s2093_s22, %s2089_s21  ;;  %p2219_p1 = scmp.eq.s32.totalorder %s1342_s29, 0 }
  0x14   : > { %p2223_p2 = scmp.eq.s32.totalorder %s1342_s29, 3  ;;  %p178_p3 = scmp.eq.s32.totalorder %s1343_s30, 3 }
  0x15   : > { %p2229_p4 = por %p2219_p1, %p62_p0  ;;  %p1344_p5 = scmp.ge.s32.totalorder %s2117_s28, 1 }
  0x16   : > { %p2234_p6 = por %p178_p3, %p62_p0  ;;  %p213_p7 = scmp.lt.s32.totalorder %s2117_s28, 5 }
  0x17   : > { %s2462_s1 = sld [smem:[#allocation26_spill]]  ;;  %s2119_s15 = smov [#allocation5]  }
  0x18   : > { %s2460_s10 = scalar_select %p2234_p6, 1, 0 }
  0x19   : > { %p2242_p8 = pnand %p1344_p5, %p213_p7  ;;  %s226_s16 = sshll.u32 %s2119_s15, 4  ;;  %s227_s16 = int_to_ptr.vmem [resolvable:$true] %s226_s16 }
  0x1a   : > { %2461 = sst [smem:[#allocation24_spill]] %s2460_s10  ;;  %s2120_s29 = smov 64  }
  0x1b   : > { %p1797_p9 = pneg %p2242_p8  ;;  %s2465_s2 = sld [smem:[#allocation27_spill]] }
  0x1c   : > { %s2121_s30 = smov 4   ;;  %s2122_s11 = smov [#allocation7]  }
  0x1d   : > { %s224_s13 = sshll.u32 %s2462_s1, 4  ;;  %p2250_p10 = pnand %p1797_p9, %p2219_p1  ;;  %s225_s13 = int_to_ptr.hbm [resolvable:$true] %s224_s13 }
  0x1e   : > { %s240_s12 = sshll.u32 %s2122_s11, 4  ;;  %s2123_s15 = smov 16   ;;  %s241_s12 = int_to_ptr.vmem [resolvable:$true] %s240_s12 }
  0x1f   : > { %1800 = dma.hbm_to_vmem [thread:$0]  (!%p2250_p10), %s225_s13, 4096, %s227_s16, [#allocation6], %s2120_s29, %s2120_s29, %s2121_s30  }
  0x20   : > { %s2124_s18 = smov 1   ;;  %s2466_s3 = sld [smem:[#allocation28_spill]] }
  0x21   : > { %s238_s20 = sshll.u32 %s2465_s2, 4  ;;  %s2125_s13 = smov [#allocation8]   ;;  %s239_s20 = int_to_ptr.hbm [resolvable:$true] %s238_s20 }
  0x22   : > { %1803 = dma.hbm_to_vmem [thread:$0]  (!%p2250_p10), %s239_s20, 32, %s241_s12, [#allocation6], %s2123_s15, %s2123_s15, %s2124_s18  }
  0x23   : > { %s254_s16 = sshll.u32 %s2125_s13, 4  ;;  %s37_s11 = sadd.s32 1, %s2109_s26  ;;  %s255_s16 = int_to_ptr.vmem [resolvable:$true] %s254_s16 }
  0x24   : > { %p38_p11 = scmp.ge.s32.totalorder %s37_s11, 2  ;;  %s40_s10 = sadd.s32 1, %s2113_s27 }
  0x25   : > { %s49_s21 = sadd.s32 1, %s2097_s23  ;;  %p56_p12 = scmp.ne.s32.totalorder %s2097_s23, %s2093_s22 }
  0x26   : > { %s252_s2 = sshll.u32 %s2466_s3, 4  ;;  %s2482_s11 = smov (%p38_p11, %s37_s11), 0  ;;  %s253_s2 = int_to_ptr.hbm [resolvable:$true] %s252_s2 }
  0x27   : > { %1806 = dma.hbm_to_vmem [thread:$0]  (!%p2250_p10), %s253_s2, 4096, %s255_s16, [#allocation9], %s2120_s29, %s2120_s29, %s2121_s30  }
  0x28   : > { %2467 = sst [smem:[#allocation25_spill]] %s2482_s11  ;;  %s2484_s10 = smov (!%p38_p11, %s40_s10), %s2113_s27 }
  0x29   : > { %s45_s1 = ssub.s32 %s2109_s26, %s2482_s11  ;;  %p57_p13 = scmp.eq.s32.totalorder %s2117_s28, 0 }
  0x2a   : > { %p42_p0 = scmp.ge.s32.totalorder %s2484_s10, 2  ;;  %p2279_p3 = por %p2223_p2, %p56_p12 }
  0x2b   : > { %p2283_p5 = por %p57_p13, %p56_p12  ;;  %p1821_p7 = scmp.lt.s32.totalorder %s2117_s28, 4 }
  0x2c   : > { %s2486_s10 = smov (%p42_p0, %s2484_s10), 0  ;;  %s271_s20 = sand.u32 1, %s2097_s23  }
  0x2d   : > { %s1652_s29 = sshll.u32 %s2109_s26, 3  ;;  %s44_s30 = ssub.s32 %s2113_s27, %s2486_s10 }
  0x2e   : > { %s46_s12 = sor.u32 %s45_s1, %s44_s30  ;;  %s1349_s15 = sshll.u32 %s271_s20, 5 }
  0x2f   : > { %p47_p9 = scmp.eq.s32.totalorder %s46_s12, 0  ;;  %s1352_s8 = sshll.u32 %s2113_s27, 4 }
  0x30   : > { %s275_s18 = scalar_lea.vmem [#allocation2], %s1349_s15  ;;  %s281_s16 = sadd.s32 %s1652_s29, %s1352_s8 }
  0x31   : > { %s286_s19 = sshll.u32 %s275_s18, 4  ;;  %s1353_s3 = sshll.u32 %s281_s16, 2  ;;  %s287_s19 = int_to_ptr.vmem [resolvable:$true] %s286_s19 }
  0x32   : > { %s2296_s13 = scalar_select %p47_p9, %s2097_s23, %s49_s21  }
  0x33   : > { %p1808_p2 = pnand %p1821_p7, %p2283_p5  ;;  %s283_s5 = scalar_lea.hbm %s2439_s0, %s1353_s3 }
  0x34   : > { %s284_s26 = sshll.u32 %s283_s5, 4  ;;  %s272_s1 = scalar_lea.sflag [#allocation3], %s271_s20  ;;  %s285_s26 = int_to_ptr.hbm [resolvable:$true] %s284_s26 }
  0x35   : > { %s2126_s30 = smov 128   ;;  %s2127_s12 = smov 8  }
  0x36   : > { %1810 = dma.hbm_to_vmem [thread:$0]  (!%p1808_p2), %s285_s26, 512, %s287_s19, %s272_s1, %s2126_s30, %s2126_s30, %s2127_s12  }
  0x37   : > { %298 = sbr.rel (%p2242_p8) target bundleno = 315 (0x13b), region = 40  ;;  %s2308_s21 = sand.u32 (!%p2242_p8), 1, %s2093_s22  }
  0x38   : > { %s2311_s2 = sshll.u32 (!%p2242_p8), %s2308_s21, 5  ;;  %s301_s6 = scalar_lea.sflag (!%p2242_p8), [#allocation3], %s2308_s21 }
  0x39   : > { %s2315_s3 = scalar_lea.vmem (!%p2242_p8), [#allocation2], %s2311_s2 }
  0x3c   : > { %2068 = dma.done.wait (%p2229_p4), %s301_s6, 512  }
  0x3d   : > { %2070 = vsyncadd (%p2229_p4), %s301_s6, 4294966784 }
  0x3e   : > { %2072 = dma.done.wait (%p2219_p1), [#allocation6], 4128  }
  0x3f   : > { %2074 = vsyncadd (%p2219_p1), [#allocation6], 4294963168 }
  0x40   : > { %2076 = dma.done.wait (%p2219_p1), [#allocation9], 4096  }
  0x41   : > { %2078 = vsyncadd (%p2219_p1), [#allocation9], 4294963200  ;;  %v1664_v0 = vld [vmem:[#allocation5 + $0x38] sm:$0xff]  ;;  %v1663_v4 = vld [vmem:[#allocation5 + $0x30] sm:$0xff]  ;;  %s2353_s7 = scalar_lea.vmem [#allocation10], %s2311_s2  ;;  %s2357_s9 = scalar_lea.vmem [#allocation11], %s2311_s2 }
  0x42   : > { %v1672_v1 = vld [vmem:[#allocation5 + $0x78] sm:$0xff]  ;;  %513 = vmatpush.bf16.msra.mxu0 %v1664_v0  ;;  %v1671_v5 = vld [vmem:[#allocation5 + $0x70] sm:$0xff]  ;;  %v1662_v8 = vld [vmem:[#allocation5 + $0x28] sm:$0xff]  ;;  %s1100_s20 = scalar_lea.sflag [#allocation4], %s2308_s21  ;;  %s1105_s29 = scalar_lea.sflag [#allocation12], %s2308_s21 }
  0x43   : > { %v1680_v2 = vld [vmem:[#allocation8 + $0x38] sm:$0xff]  ;;  %532 = vmatpush.bf16.msra.mxu1 %v1672_v1  ;;  %v1679_v6 = vld [vmem:[#allocation8 + $0x30] sm:$0xff]  ;;  %v1670_v9 = vld [vmem:[#allocation5 + $0x68] sm:$0xff] }
  0x44   : > { %v1688_v3 = vld [vmem:[#allocation8 + $0x78] sm:$0xff]  ;;  %683 = vmatpush.bf16.msra.mxu2 %v1680_v2  ;;  %v1687_v7 = vld [vmem:[#allocation8 + $0x70] sm:$0xff]  ;;  %v1678_v10 = vld [vmem:[#allocation8 + $0x28] sm:$0xff] }
  0x45   : > { %702 = vmatpush.bf16.msra.mxu3 %v1688_v3  ;;  %v1686_v11 = vld [vmem:[#allocation8 + $0x68] sm:$0xff]  ;;  %v1661_v12 = vld [vmem:[#allocation5 + $0x20] sm:$0xff]  ;;  %v1660_v16 = vld [vmem:[#allocation5 + $0x18] sm:$0xff] }
  0x46   : > { %514 = vmatpush.bf16.msra.mxu0 %v1663_v4  ;;  %v1669_v13 = vld [vmem:[#allocation5 + $0x60] sm:$0xff]  ;;  %v1668_v17 = vld [vmem:[#allocation5 + $0x58] sm:$0xff]  ;;  %v1659_v20 = vld [vmem:[#allocation5 + $0x10] sm:$0xff] }
  0x47   : > { %533 = vmatpush.bf16.msra.mxu1 %v1671_v5  ;;  %v1677_v14 = vld [vmem:[#allocation8 + $0x20] sm:$0xff]  ;;  %v1676_v18 = vld [vmem:[#allocation8 + $0x18] sm:$0xff]  ;;  %v1667_v21 = vld [vmem:[#allocation5 + $0x50] sm:$0xff] }
  0x48   : > { %684 = vmatpush.bf16.msra.mxu2 %v1679_v6  ;;  %v1685_v15 = vld [vmem:[#allocation8 + $0x60] sm:$0xff]  ;;  %v1684_v19 = vld [vmem:[#allocation8 + $0x58] sm:$0xff]  ;;  %v1675_v22 = vld [vmem:[#allocation8 + $0x10] sm:$0xff] }
  0x49   : > { %703 = vmatpush.bf16.msra.mxu3 %v1687_v7  ;;  %v1683_v23 = vld [vmem:[#allocation8 + $0x50] sm:$0xff]  ;;  %v1658_v24 = vld [vmem:[#allocation5 + $0x8] sm:$0xff]  ;;  %v1657_v28 = vld [vmem:[#allocation5] sm:$0xff] }
  0x4a   : > { %515 = vmatpush.bf16.msra.mxu0 %v1662_v8  ;;  %v1666_v25 = vld [vmem:[#allocation5 + $0x48] sm:$0xff]  ;;  %v1665_v29 = vld [vmem:[#allocation5 + $0x40] sm:$0xff]  ;;  %v1696_v37 = vld [vmem:[#allocation5 + $0xb8] sm:$0xff] }
  0x4b   : > { %534 = vmatpush.bf16.msra.mxu1 %v1670_v9  ;;  %v1674_v26 = vld [vmem:[#allocation8 + $0x8] sm:$0xff]  ;;  %v1363_v30 = vld [vmem:[%s2315_s3] sm:$0xf]  ;;  %v1653_v32 = vld [vmem:[%s2315_s3 + $0x4] sm:$0xf] }
  0x4c   : > { %685 = vmatpush.bf16.msra.mxu2 %v1678_v10  ;;  %v1682_v27 = vld [vmem:[#allocation8 + $0x48] sm:$0xff]  ;;  %v1673_v34 = vld [vmem:[#allocation8] sm:$0xff]  ;;  %v1712_v36 = vld [vmem:[#allocation8 + $0xb8] sm:$0xff] }
  0x4d   : > { %704 = vmatpush.bf16.msra.mxu3 %v1686_v11  ;;  %v1654_v31 = vld [vmem:[%s2315_s3 + $0x4] sm:$0xf0]  ;;  %v1365_v33 = vld [vmem:[%s2315_s3 + $0x8] sm:$0xf0]  ;;  %v1704_v40 = vld [vmem:[#allocation5 + $0xf8] sm:$0xff] }
  0x4e   : > { %516 = vmatpush.bf16.msra.mxu0 %v1661_v12  ;;  %v1681_v35 = vld [vmem:[#allocation8 + $0x40] sm:$0xff]  ;;  %v2333_v38 = vor.u32 %v1654_v31, %v1363_v30  ;;  %v2335_v39 = vor.u32 %v1653_v32, %v1365_v33  ;;  %v1720_v41 = vld [vmem:[#allocation8 + $0xf8] sm:$0xff]  ;;  %v1711_v42 = vld [vmem:[#allocation8 + $0xb0] sm:$0xff] }
  0x4f   : > { %535 = vmatpush.bf16.msra.mxu1 %v1669_v13  ;;  %v1695_v43 = vld [vmem:[#allocation5 + $0xb0] sm:$0xff]  ;;  %v1694_v47 = vld [vmem:[#allocation5 + $0xa8] sm:$0xff]  ;;  %v1693_v51 = vld [vmem:[#allocation5 + $0xa0] sm:$0xff] }
  0x50   : > { %686 = vmatpush.bf16.msra.mxu2 %v1677_v14  ;;  %v1703_v44 = vld [vmem:[#allocation5 + $0xf0] sm:$0xff]  ;;  %v1702_v48 = vld [vmem:[#allocation5 + $0xe8] sm:$0xff]  ;;  %v1656_v53 = vld [vmem:[%s2315_s3 + $0x14] sm:$0xf0] }
  0x51   : > { %705 = vmatpush.bf16.msra.mxu3 %v1685_v15  ;;  %v1719_v45 = vld [vmem:[#allocation8 + $0xf0] sm:$0xff]  ;;  %v1710_v46 = vld [vmem:[#allocation8 + $0xa8] sm:$0xff]  ;;  %v1709_v50 = vld [vmem:[#allocation8 + $0xa0] sm:$0xff] }
  0x52   : > { %517 = vmatpush.bf16.msra.mxu0 %v1660_v16  ;;  %v1718_v49 = vld [vmem:[#allocation8 + $0xe8] sm:$0xff]  ;;  %v1655_v54 = vld [vmem:[%s2315_s3 + $0x14] sm:$0xf]  ;;  %v1373_v55 = vld [vmem:[%s2315_s3 + $0x18] sm:$0xf0] }
  0x53   : > { %536 = vmatpush.bf16.msra.mxu1 %v1668_v17  ;;  %v1371_v52 = vld [vmem:[%s2315_s3 + $0x10] sm:$0xf]  ;;  %v1701_v56 = vld [vmem:[#allocation5 + $0xe0] sm:$0xff]  ;;  %v1692_v59 = vld [vmem:[#allocation5 + $0x98] sm:$0xff]  ;;  %v1376_v61 = vor.u32 %v1655_v54, %v1373_v55 }
  0x54   : > { %687 = vmatpush.bf16.msra.mxu2 %v1676_v18  ;;  %v1717_v57 = vld [vmem:[#allocation8 + $0xe0] sm:$0xff]  ;;  %v1708_v58 = vld [vmem:[#allocation8 + $0x98] sm:$0xff]  ;;  %v1372_v60 = vor.u32 %v1656_v53, %v1371_v52  ;;  %v1707_v0 = vld [vmem:[#allocation8 + $0x90] sm:$0xff] }
  0x55   : > { %706 = vmatpush.bf16.msra.mxu3 %v1684_v19  ;;  %v1700_v62 = vld [vmem:[#allocation5 + $0xd8] sm:$0xff]  ;;  %v1691_v1 = vld [vmem:[#allocation5 + $0x90] sm:$0xff]  ;;  %v1690_v5 = vld [vmem:[#allocation5 + $0x88] sm:$0xff] }
  0x56   : > { %518 = vmatpush.bf16.msra.mxu0 %v1659_v20  ;;  %v1716_v63 = vld [vmem:[#allocation8 + $0xd8] sm:$0xff]  ;;  %v1699_v2 = vld [vmem:[#allocation5 + $0xd0] sm:$0xff]  ;;  %v1698_v6 = vld [vmem:[#allocation5 + $0xc8] sm:$0xff] }
  0x57   : > { %537 = vmatpush.bf16.msra.mxu1 %v1667_v21  ;;  %v1715_v3 = vld [vmem:[#allocation8 + $0xd0] sm:$0xff]  ;;  %v1706_v4 = vld [vmem:[#allocation8 + $0x88] sm:$0xff]  ;;  %v1705_v8 = vld [vmem:[#allocation8 + $0x80] sm:$0xff] }
  0x58   : > { %688 = vmatpush.bf16.msra.mxu2 %v1675_v22  ;;  %v1714_v7 = vld [vmem:[#allocation8 + $0xc8] sm:$0xff]  ;;  %v1689_v9 = vld [vmem:[#allocation5 + $0x80] sm:$0xff] }
  0x59   : > { %707 = vmatpush.bf16.msra.mxu3 %v1683_v23  ;;  %v1697_v10 = vld [vmem:[#allocation5 + $0xc0] sm:$0xff] }
  0x5a   : > { %519 = vmatpush.bf16.msra.mxu0 %v1658_v24  ;;  %v1713_v11 = vld [vmem:[#allocation8 + $0xc0] sm:$0xff]  ;;  %v1911_v14 = vld [vmem:[#allocation7] ss:$0 sm:$0xff] }
  0x5b   : > { %538 = vmatpush.bf16.msra.mxu1 %v1666_v25  ;;  %v1912_v21 = vld [vmem:[%s2443_s4] ss:$0 sm:$0xff] }
  0x5c   : > { %689 = vmatpush.bf16.msra.mxu2 %v1674_v26 }
  0x5d   : > { %708 = vmatpush.bf16.msra.mxu3 %v1682_v27 }
  0x5e   : > { %520 = vmatpush.bf16.msra.mxu0 %v1657_v28 }
  0x5f   : > { %539 = vmatpush.bf16.msra.mxu1 %v1665_v29 }
  0x60   : > { %690 = vmatpush.bf16.msra.mxu2 %v1673_v34 }
  0x61   : > { %709 = vmatpush.bf16.msra.mxu3 %v1681_v35  ;;  %521 = vmatmul.bf16.vlgmr.msra.gmra.mxu0 %v2333_v38 }
  0x62   : > { %871 = vmatpush.bf16.msrb.mxu0 %v1696_v37  ;;  %540 = vmatmul.bf16.vlgmr.msra.gmra.mxu1 %v2335_v39 }
  0x63   : > { %691 = vmatmul.bf16.vlgmr.msra.gmra.mxu2 %v2333_v38  ;;  %890 = vmatpush.bf16.msrb.mxu1 %v1704_v40 }
  0x64   : > { %1043 = vmatpush.bf16.msrb.mxu2 %v1712_v36  ;;  %710 = vmatmul.bf16.vlgmr.msra.gmra.mxu3 %v2335_v39 }
  0x65   : > { %1062 = vmatpush.bf16.msrb.mxu3 %v1720_v41 }
  0x66   : > { %872 = vmatpush.bf16.msrb.mxu0 %v1695_v43 }
  0x67   : > { %891 = vmatpush.bf16.msrb.mxu1 %v1703_v44 }
  0x68   : > { %1044 = vmatpush.bf16.msrb.mxu2 %v1711_v42 }
  0x69   : > { %1063 = vmatpush.bf16.msrb.mxu3 %v1719_v45 }
  0x6a   : > { %873 = vmatpush.bf16.msrb.mxu0 %v1694_v47 }
  0x6b   : > { %892 = vmatpush.bf16.msrb.mxu1 %v1702_v48 }
  0x6c   : > { %1045 = vmatpush.bf16.msrb.mxu2 %v1710_v46 }
  0x6d   : > { %1064 = vmatpush.bf16.msrb.mxu3 %v1718_v49 }
  0x6e   : > { %874 = vmatpush.bf16.msrb.mxu0 %v1693_v51  ;;  %v1913_v51 = vld [vmem:[#allocation7 + $0x1] ss:$0 sm:$0xff] }
  0x6f   : > { %893 = vmatpush.bf16.msrb.mxu1 %v1701_v56 }
  0x70   : > { %1046 = vmatpush.bf16.msrb.mxu2 %v1709_v50 }
  0x71   : > { %1065 = vmatpush.bf16.msrb.mxu3 %v1717_v57  ;;  %526 = vmatmul.bf16.gmra.mxu0 %v1372_v60 }
  0x72   : > { %875 = vmatpush.bf16.msrb.mxu0 %v1692_v59  ;;  %545 = vmatmul.bf16.gmra.mxu1 %v1376_v61  ;;  %v1914_v59 = vld [vmem:[%s2443_s4 + $0x1] ss:$0 sm:$0xff] }
  0x73   : > { %696 = vmatmul.bf16.gmra.mxu2 %v1372_v60  ;;  %894 = vmatpush.bf16.msrb.mxu1 %v1700_v62 }
  0x74   : > { %1047 = vmatpush.bf16.msrb.mxu2 %v1708_v58  ;;  %715 = vmatmul.bf16.gmra.mxu3 %v1376_v61 }
  0x75   : > { %1066 = vmatpush.bf16.msrb.mxu3 %v1716_v63 }
  0x76   : > { %876 = vmatpush.bf16.msrb.mxu0 %v1691_v1 }
  0x77   : > { %895 = vmatpush.bf16.msrb.mxu1 %v1699_v2 }
  0x78   : > { %1048 = vmatpush.bf16.msrb.mxu2 %v1707_v0 }
  0x79   : > { %1067 = vmatpush.bf16.msrb.mxu3 %v1715_v3 }
  0x7a   : > { %877 = vmatpush.bf16.msrb.mxu0 %v1690_v5 }
  0x7b   : > { %896 = vmatpush.bf16.msrb.mxu1 %v1698_v6 }
  0x7c   : > { %1049 = vmatpush.bf16.msrb.mxu2 %v1706_v4 }
  0x7d   : > { %1068 = vmatpush.bf16.msrb.mxu3 %v1714_v7 }
  0x7e   : > { %878 = vmatpush.bf16.msrb.mxu0 %v1689_v9 }
  0x7f   : > { %897 = vmatpush.bf16.msrb.mxu1 %v1697_v10 }
  0x80   : > { %1050 = vmatpush.bf16.msrb.mxu2 %v1705_v8 }
  0x81   : > { %1069 = vmatpush.bf16.msrb.mxu3 %v1713_v11  ;;  %879 = vmatmul.bf16.vlgmr.msrb.gmra.mxu0 %v2333_v38 }
  0x82   : > { %898 = vmatmul.bf16.vlgmr.msrb.gmra.mxu1 %v2335_v39 }
  0x83   : > { %1051 = vmatmul.bf16.vlgmr.msrb.gmra.mxu2 %v2333_v38 }
  0x84   : > { %1070 = vmatmul.bf16.vlgmr.msrb.gmra.mxu3 %v2335_v39 }
  0x91   : > { %884 = vmatmul.bf16.gmra.mxu0 %v1372_v60 }
  0x92   : > { %903 = vmatmul.bf16.gmra.mxu1 %v1376_v61 }
  0x93   : > { %1056 = vmatmul.bf16.gmra.mxu2 %v1372_v60 }
  0x94   : > { %1075 = vmatmul.bf16.gmra.mxu3 %v1376_v61 }
  0xde   : > { %v522_v12 = vpop.f32.mrf.mxu0 }
  0xdf   : > { %v541_v13 = vpop.f32.mrf.mxu1  ;;  %v523_v15 = vadd.f32 %v1911_v14, %v522_v12 }
  0xe1   : > { %v542_v22 = vadd.f32 %v541_v13, %v523_v15 }
  0xe6   : > { %v692_v16 = vpop.f32.mrf.mxu2  ;;  %v524_v18 = vpop.f32.mrf.mxu0 }
  0xe7   : > { %v711_v17 = vpop.f32.mrf.mxu3  ;;  %v543_v19 = vpop.f32.mrf.mxu1  ;;  %v525_v20 = vadd.f32 %v1911_v14, %v524_v18  ;;  %v693_v25 = vadd.f32 %v1912_v21, %v692_v16 }
  0xe9   : > { %v544_v23 = vadd.f32 %v543_v19, %v525_v20  ;;  %v712_v31 = vadd.f32 %v711_v17, %v693_v25 }
  0xeb   : > { %v1724_v24 = vpack.c.bf16 %v544_v23, %v542_v22 }
  0xed   : > { %1725 = vst [vmem:[%s2353_s7] sm:$0xff] %v1724_v24  }
  0xee   : > { %v694_v26 = vpop.f32.mrf.mxu2  ;;  %v527_v29 = vpop.f32.mrf.mxu0 }
  0xef   : > { %v713_v27 = vpop.f32.mrf.mxu3  ;;  %v695_v28 = vadd.f32 %v1912_v21, %v694_v26  ;;  %v546_v30 = vpop.f32.mrf.mxu1  ;;  %v528_v34 = vadd.f32 %v1911_v14, %v527_v29 }
  0xf1   : > { %v714_v32 = vadd.f32 %v713_v27, %v695_v28  ;;  %v547_v40 = vadd.f32 %v546_v30, %v528_v34 }
  0xf3   : > { %v1734_v33 = vpack.c.bf16 %v714_v32, %v712_v31 }
  0xf5   : > { %1735 = vst [vmem:[%s2357_s9] sm:$0xff] %v1734_v33  }
  0xf6   : > { %v697_v35 = vpop.f32.mrf.mxu2  ;;  %v529_v37 = vpop.f32.mrf.mxu0 }
  0xf7   : > { %v716_v36 = vpop.f32.mrf.mxu3  ;;  %v548_v38 = vpop.f32.mrf.mxu1  ;;  %v530_v39 = vadd.f32 %v1911_v14, %v529_v37  ;;  %v698_v43 = vadd.f32 %v1912_v21, %v697_v35 }
  0xf9   : > { %v549_v41 = vadd.f32 %v548_v38, %v530_v39  ;;  %v717_v49 = vadd.f32 %v716_v36, %v698_v43 }
  0xfb   : > { %v1729_v42 = vpack.c.bf16 %v549_v41, %v547_v40 }
  0xfd   : > { %1761 = vst [vmem:[%s2353_s7 + $0x8] sm:$0xff] %v1729_v42  }
  0xfe   : > { %v699_v44 = vpop.f32.mrf.mxu2  ;;  %v880_v47 = vpop.f32.mrf.mxu0 }
  0xff   : > { %v718_v45 = vpop.f32.mrf.mxu3  ;;  %v700_v46 = vadd.f32 %v1912_v21, %v699_v44  ;;  %v899_v48 = vpop.f32.mrf.mxu1  ;;  %v881_v53 = vadd.f32 %v1913_v51, %v880_v47 }
 0x101   : > { %v719_v50 = vadd.f32 %v718_v45, %v700_v46  ;;  %v900_v60 = vadd.f32 %v899_v48, %v881_v53 }
 0x103   : > { %v1739_v52 = vpack.c.bf16 %v719_v50, %v717_v49 }
 0x105   : > { %1762 = vst [vmem:[%s2357_s9 + $0x8] sm:$0xff] %v1739_v52  }
 0x106   : > { %v1052_v54 = vpop.f32.mrf.mxu2  ;;  %v882_v56 = vpop.f32.mrf.mxu0 }
 0x107   : > { %v1071_v55 = vpop.f32.mrf.mxu3  ;;  %v883_v57 = vadd.f32 %v1913_v51, %v882_v56  ;;  %v901_v58 = vpop.f32.mrf.mxu1  ;;  %v1053_v63 = vadd.f32 %v1914_v59, %v1052_v54 }
 0x109   : > { %v902_v61 = vadd.f32 %v901_v58, %v883_v57  ;;  %v1072_v5 = vadd.f32 %v1071_v55, %v1053_v63 }
 0x10b   : > { %v1744_v62 = vpack.c.bf16 %v902_v61, %v900_v60 }
 0x10d   : > { %1763 = vst [vmem:[%s2353_s7 + $0x10] sm:$0xff] %v1744_v62  }
 0x10e   : > { %v1054_v0 = vpop.f32.mrf.mxu2  ;;  %v885_v3 = vpop.f32.mrf.mxu0 }
 0x10f   : > { %v1055_v1 = vadd.f32 %v1914_v59, %v1054_v0  ;;  %v1073_v2 = vpop.f32.mrf.mxu3  ;;  %v904_v4 = vpop.f32.mrf.mxu1  ;;  %v886_v8 = vadd.f32 %v1913_v51, %v885_v3 }
 0x111   : > { %v1074_v6 = vadd.f32 %v1073_v2, %v1055_v1  ;;  %v905_v14 = vadd.f32 %v904_v4, %v886_v8 }
 0x113   : > { %v1754_v7 = vpack.c.bf16 %v1074_v6, %v1072_v5 }
 0x115   : > { %1765 = vst [vmem:[%s2357_s9 + $0x10] sm:$0xff] %v1754_v7  }
 0x116   : > { %v1057_v9 = vpop.f32.mrf.mxu2  ;;  %v887_v11 = vpop.f32.mrf.mxu0 }
 0x117   : > { %v1076_v10 = vpop.f32.mrf.mxu3  ;;  %v888_v12 = vadd.f32 %v1913_v51, %v887_v11  ;;  %v906_v13 = vpop.f32.mrf.mxu1  ;;  %v1058_v17 = vadd.f32 %v1914_v59, %v1057_v9 }
 0x119   : > { %v907_v15 = vadd.f32 %v906_v13, %v888_v12  ;;  %v1077_v21 = vadd.f32 %v1076_v10, %v1058_v17 }
 0x11b   : > { %v1749_v16 = vpack.c.bf16 %v907_v15, %v905_v14 }
 0x11d   : > { %1764 = vst [vmem:[%s2353_s7 + $0x18] sm:$0xff] %v1749_v16  }
 0x11e   : > { %v1059_v18 = vpop.f32.mrf.mxu2 }
 0x11f   : > { %v1060_v19 = vadd.f32 %v1914_v59, %v1059_v18  ;;  %v1078_v20 = vpop.f32.mrf.mxu3 }
 0x121   : > { %v1079_v22 = vadd.f32 %v1078_v20, %v1060_v19 }
 0x123   : > { %v1759_v23 = vpack.c.bf16 %v1079_v22, %v1077_v21 }
 0x125   : > { %1766 = vst [vmem:[%s2357_s9 + $0x18] sm:$0xff] %v1759_v23  }
 0x126   : > { %s1644_s15 = sshll.u32 %s2101_s24, 2  ;;  %s1645_s8 = sshll.u32 %s2105_s25, 4 }
 0x127   : > { %s1116_s18 = sadd.s32 %s1645_s8, %s1644_s15  ;;  %s1129_s19 = sshll.u32 %s2353_s7, 4  ;;  %s1130_s19 = int_to_ptr.vmem [resolvable:$true] %s1129_s19 }
 0x128   : > { %s1646_s16 = sshll.u32 %s1116_s18, 2  ;;  %s2470_s12 = sld [smem:[#allocation29_spill]] }
 0x129   : > { %s2128_s3 = smov 256   ;;  %s2129_s5 = smov 512  }
 0x12a   : > { %1781 = sst [smem:[#allocation14]] (%p2279_p3), %s2128_s3  ;;  %s2130_s24 = smov 4  }
 0x12b   : > { %1782 = sst [smem:[#allocation14 + $0x1]] (%p2279_p3), %s2129_s5  ;;  %s2131_s25 = smov 64  }
 0x12c   : > { %1783 = sst [smem:[#allocation14 + $0x2]] (%p2279_p3), %s2130_s24  ;;  %s2132_s26 = smov [#allocation13]  }
 0x12d   : > { %1784 = sst [smem:[#allocation14 + $0x3]] (%p2279_p3), %s2131_s25  ;;  %s2133_s7 = smov 0  }
 0x12e   : > { %s1118_s2 = scalar_lea.hbm %s2470_s12, %s1646_s16  ;;  %1785 = sst [smem:[#allocation14 + $0x4]] (%p2279_p3), %s2131_s25 }
 0x12f   : > { %s1131_s6 = sshll.u32 %s1118_s2, 4  ;;  %1786 = sst [smem:[#allocation14 + $0x5]] (%p2279_p3), %s2130_s24  ;;  %s1132_s6 = int_to_ptr.hbm [resolvable:$true] %s1131_s6 }
 0x130   : > { %1787 = dma.general (%p2279_p3), %s1130_s19, 512, %s1132_s6, %s1100_s20, %s2132_s26, [#allocation14], %s2133_s7, 0  }
 0x131   : > { %s2471_s15 = sld [smem:[#allocation30_spill]]  ;;  %s1171_s18 = sshll.u32 %s2357_s9, 4  ;;  %s1172_s18 = int_to_ptr.vmem [resolvable:$true] %s1171_s18 }
 0x132   : > { %s2134_s30 = smov 256   ;;  %s2135_s20 = smov 512  }
 0x133   : > { %1788 = sst [smem:[#allocation16]] (%p2279_p3), %s2134_s30  ;;  %s2136_s19 = smov 4  }
 0x134   : > { %1789 = sst [smem:[#allocation16 + $0x1]] (%p2279_p3), %s2135_s20  ;;  %s2137_s12 = smov 64  }
 0x135   : > { %1790 = sst [smem:[#allocation16 + $0x2]] (%p2279_p3), %s2136_s19  ;;  %s2138_s9 = smov [#allocation15]  }
 0x136   : > { %1791 = sst [smem:[#allocation16 + $0x3]] (%p2279_p3), %s2137_s12 }
 0x137   : > { %s1160_s8 = scalar_lea.hbm %s2471_s15, %s1646_s16  ;;  %1792 = sst [smem:[#allocation16 + $0x4]] (%p2279_p3), %s2137_s12 }
 0x138   : > { %s1173_s1 = sshll.u32 %s1160_s8, 4  ;;  %1793 = sst [smem:[#allocation16 + $0x5]] (%p2279_p3), %s2136_s19  ;;  %s1174_s1 = int_to_ptr.hbm [resolvable:$true] %s1173_s1 }
 0x139   : > { %s2139_s16 = smov 0  }
 0x13a   : > { %1794 = dma.general (%p2279_p3), %s1172_s18, 512, %s1174_s1, %s1105_s29, %s2138_s9, [#allocation16], %s2139_s16, 0  }
 0x13b PF: > { %s2472_s2 = sld [smem:[#allocation22_spill]]  ;;  %p1825_p1 = scmp.ge.s32.totalorder %s2117_s28, 2 }
 0x13d   : > { %p1812_p4 = pnand %p1825_p1, %p2234_p6 }
 0x13f   : > { %p1813_p8 = pneg %p1812_p4 }
 0x141   : > { %s1201_s3 = sand.u32 1, %s2472_s2  }
 0x142   : > { %s1202_s5 = scalar_lea.sflag [#allocation4], %s1201_s3 }
 0x143   : > { %2080 = dma.done.wait (%p1813_p8), %s1202_s5, 512  }
 0x144   : > { %2082 = vsyncadd (%p1813_p8), %s1202_s5, 4294966784  ;;  %s1212_s24 = scalar_lea.sflag [#allocation12], %s1201_s3 }
 0x145   : > { %2084 = dma.done.wait (%p1813_p8), %s1212_s24, 512  }
 0x146   : > { %2086 = vsyncadd (%p1813_p8), %s1212_s24, 4294966784  ;;  %s28_s28 = sadd.s32 1, %s2117_s28   ;;  %s2474_s24 = sld [smem:[#allocation23_spill]] }
 0x147   : > { %p25_p10 = scmp.ge.s32.totalorder %s28_s28, 6   ;;  %s2475_s26 = sld [smem:[#allocation25_spill]] }
 0x148   : > { %s2476_s21 = smov %s2093_s22  ;;  %s2477_s22 = smov %s2097_s23 }
 0x149   : > { %s2478_s23 = smov %s2296_s13  ;;  %s2479_s25 = smov %s2113_s27 }
 0x14a   : > { %s2480_s27 = smov %s2486_s10  ;;  %27 = sbr.rel (!%p25_p10) target bundleno = 17 (0x11), region = 130 }
 0x14f   :  { %1218 = vsyncpa [#allocation3], 1 }
 0x150   :  { %1220 = vsyncpa [#allocation3 + $0x1], 1 }
 0x151   :  { %1221 = vsyncpa [#allocation6], 1 }
 0x152   :  { %1222 = vsyncpa [#allocation9], 1 }
 0x153   :  { %1223 = vsyncpa [#allocation4], 1 }
 0x154   :  { %1225 = vsyncpa [#allocation4 + $0x1], 1 }
 0x155   :  { %1226 = vsyncpa [#allocation12], 1 }
 0x156   :  { %1228 = vsyncpa [#allocation12 + $0x1], 1 }

// kernel: tpu_custom_call.1
= control target key start
LH: loop header
LB: loop body
LE: loop exit
PB: predicated region body
PF: predicated region fallthrough
CT: control target
= control target key end

     0   :  { %s2439_s0 = inlined_call_operand.hbm [shape: bf16[2,64,256], index: 0, kind: input, shape index: {}]   ;;  %s2440_s1 = inlined_call_operand.hbm [shape: bf16[2,256,128], index: 1, kind: input, shape index: {}]   ;;  %s2441_s2 = inlined_call_operand.hbm [shape: f32[2,1,128], index: 2, kind: input, shape index: {}]   ;;  %s2442_s3 = inlined_call_operand.hbm [shape: bf16[2,256,128], index: 3, kind: input, shape index: {}]   ;;  %s2443_s4 = inlined_call_operand.vmem [shape: f32[2,1,128], index: 4, kind: input, shape index: {}]   ;;  %s2444_s5 = inlined_call_operand.hbm [shape: bf16[2,2,64,128], index: 5, kind: output, shape index: {0}]   ;;  %s2445_s6 = inlined_call_operand.hbm [shape: bf16[2,2,64,128], index: 6, kind: output, shape index: {1}]  }
   0x1   :  { %2450 = sst [smem:[#allocation26_spill]] %s2440_s1 }
   0x2   :  { %2451 = sst [smem:[#allocation27_spill]] %s2441_s2 }
   0x3   :  { %2452 = sst [smem:[#allocation28_spill]] %s2442_s3 }
   0x4   :  { %2453 = sst [smem:[#allocation29_spill]] %s2444_s5 }
   0x5   :  { %2454 = sst [smem:[#allocation30_spill]] %s2445_s6 }
   0x6   :  { %12 = vsyncpa [#allocation3], 0 }
   0x7   :  { %14 = vsyncpa [#allocation3 + $0x1], 0 }
   0x8   :  { %15 = vsyncpa [#allocation6], 0 }
   0x9   :  { %16 = vsyncpa [#allocation9], 0 }
   0xa   :  { %17 = vsyncpa [#allocation4], 0 }
   0xb   :  { %19 = vsyncpa [#allocation4 + $0x1], 0 }
   0xc   :  { %20 = vsyncpa [#allocation12], 0 }
   0xd   :  { %22 = vsyncpa [#allocation12 + $0x1], 0  ;;  %s2175_s21 = smov 0   ;;  %s2177_s22 = smov 0  }
   0xe   :  { %s2179_s23 = smov 0   ;;  %s2181_s24 = smov 0  }
   0xf   :  { %s2183_s25 = smov 0   ;;  %s2185_s26 = smov 0  }
  0x10   :  { %s2187_s27 = smov 0   ;;  %s2189_s28 = smov 0  }
  0x11 LB: > { %2455 = sst [smem:[#allocation22_spill]] %s2089_s21  ;;  %s1342_s29 = sadd.s32 4294967295, %s2117_s28   ;;  %s2117_s28 = sphi %s2189_s28, %s28_s28   ;;  %s2113_s27 = sphi %s2187_s27, %s2480_s27   ;;  %s2109_s26 = sphi %s2185_s26, %s2475_s26   ;;  %s2105_s25 = sphi %s2183_s25, %s2479_s25   ;;  %s2101_s24 = sphi %s2181_s24, %s2474_s24   ;;  %s2097_s23 = sphi %s2179_s23, %s2478_s23   ;;  %s2093_s22 = sphi %s2177_s22, %s2477_s22   ;;  %s2089_s21 = sphi %s2175_s21, %s2476_s21  }
  0x12   : > { %2456 = sst [smem:[#allocation23_spill]] %s2109_s26  ;;  %s1343_s30 = sadd.s32 4294967294, %s2117_s28  }
  0x13   : > { %p62_p0 = scmp.ne.s32.totalorder %s2093_s22, %s2089_s21  ;;  %p2219_p1 = scmp.eq.s32.totalorder %s1342_s29, 0 }
  0x14   : > { %p2223_p2 = scmp.eq.s32.totalorder %s1342_s29, 3  ;;  %p178_p3 = scmp.eq.s32.totalorder %s1343_s30, 3 }
  0x15   : > { %p2229_p4 = por %p2219_p1, %p62_p0  ;;  %p1344_p5 = scmp.ge.s32.totalorder %s2117_s28, 1 }
  0x16   : > { %p2234_p6 = por %p178_p3, %p62_p0  ;;  %p213_p7 = scmp.lt.s32.totalorder %s2117_s28, 5 }
  0x17   : > { %s2462_s1 = sld [smem:[#allocation26_spill]]  ;;  %s2119_s15 = smov [#allocation5]  }
  0x18   : > { %s2460_s10 = scalar_select %p2234_p6, 1, 0 }
  0x19   : > { %p2242_p8 = pnand %p1344_p5, %p213_p7  ;;  %s226_s16 = sshll.u32 %s2119_s15, 4  ;;  %s227_s16 = int_to_ptr.vmem [resolvable:$true] %s226_s16 }
  0x1a   : > { %2461 = sst [smem:[#allocation24_spill]] %s2460_s10  ;;  %s2120_s29 = smov 64  }
  0x1b   : > { %p1797_p9 = pneg %p2242_p8  ;;  %s2465_s2 = sld [smem:[#allocation27_spill]] }
  0x1c   : > { %s2121_s30 = smov 4   ;;  %s2122_s11 = smov [#allocation7]  }
  0x1d   : > { %s224_s13 = sshll.u32 %s2462_s1, 4  ;;  %p2250_p10 = pnand %p1797_p9, %p2219_p1  ;;  %s225_s13 = int_to_ptr.hbm [resolvable:$true] %s224_s13 }
  0x1e   : > { %s240_s12 = sshll.u32 %s2122_s11, 4  ;;  %s2123_s15 = smov 16   ;;  %s241_s12 = int_to_ptr.vmem [resolvable:$true] %s240_s12 }
  0x1f   : > { %1800 = dma.hbm_to_vmem [thread:$0]  (!%p2250_p10), %s225_s13, 4096, %s227_s16, [#allocation6], %s2120_s29, %s2120_s29, %s2121_s30  }
  0x20   : > { %s2124_s18 = smov 1   ;;  %s2466_s3 = sld [smem:[#allocation28_spill]] }
  0x21   : > { %s238_s20 = sshll.u32 %s2465_s2, 4  ;;  %s2125_s13 = smov [#allocation8]   ;;  %s239_s20 = int_to_ptr.hbm [resolvable:$true] %s238_s20 }
  0x22   : > { %1803 = dma.hbm_to_vmem [thread:$0]  (!%p2250_p10), %s239_s20, 32, %s241_s12, [#allocation6], %s2123_s15, %s2123_s15, %s2124_s18  }
  0x23   : > { %s254_s16 = sshll.u32 %s2125_s13, 4  ;;  %s37_s11 = sadd.s32 1, %s2109_s26  ;;  %s255_s16 = int_to_ptr.vmem [resolvable:$true] %s254_s16 }
  0x24   : > { %p38_p11 = scmp.ge.s32.totalorder %s37_s11, 2  ;;  %s40_s10 = sadd.s32 1, %s2113_s27 }
  0x25   : > { %s49_s21 = sadd.s32 1, %s2097_s23  ;;  %p56_p12 = scmp.ne.s32.totalorder %s2097_s23, %s2093_s22 }
  0x26   : > { %s252_s2 = sshll.u32 %s2466_s3, 4  ;;  %s2482_s11 = smov (%p38_p11, %s37_s11), 0  ;;  %s253_s2 = int_to_ptr.hbm [resolvable:$true] %s252_s2 }
  0x27   : > { %1806 = dma.hbm_to_vmem [thread:$0]  (!%p2250_p10), %s253_s2, 4096, %s255_s16, [#allocation9], %s2120_s29, %s2120_s29, %s2121_s30  }
  0x28   : > { %2467 = sst [smem:[#allocation25_spill]] %s2482_s11  ;;  %s2484_s10 = smov (!%p38_p11, %s40_s10), %s2113_s27 }
  0x29   : > { %s45_s1 = ssub.s32 %s2109_s26, %s2482_s11  ;;  %p57_p13 = scmp.eq.s32.totalorder %s2117_s28, 0 }
  0x2a   : > { %p42_p0 = scmp.ge.s32.totalorder %s2484_s10, 2  ;;  %p2279_p3 = por %p2223_p2, %p56_p12 }
  0x2b   : > { %p2283_p5 = por %p57_p13, %p56_p12  ;;  %p1821_p7 = scmp.lt.s32.totalorder %s2117_s28, 4 }
  0x2c   : > { %s2486_s10 = smov (%p42_p0, %s2484_s10), 0  ;;  %s271_s20 = sand.u32 1, %s2097_s23  }
  0x2d   : > { %s1652_s29 = sshll.u32 %s2109_s26, 3  ;;  %s44_s30 = ssub.s32 %s2113_s27, %s2486_s10 }
  0x2e   : > { %s46_s12 = sor.u32 %s45_s1, %s44_s30  ;;  %s1349_s15 = sshll.u32 %s271_s20, 5 }
  0x2f   : > { %p47_p9 = scmp.eq.s32.totalorder %s46_s12, 0  ;;  %s1352_s8 = sshll.u32 %s2113_s27, 4 }
  0x30   : > { %s275_s18 = scalar_lea.vmem [#allocation2], %s1349_s15  ;;  %s281_s16 = sadd.s32 %s1652_s29, %s1352_s8 }
  0x31   : > { %s286_s19 = sshll.u32 %s275_s18, 4  ;;  %s1353_s3 = sshll.u32 %s281_s16, 2  ;;  %s287_s19 = int_to_ptr.vmem [resolvable:$true] %s286_s19 }
  0x32   : > { %s2296_s13 = scalar_select %p47_p9, %s2097_s23, %s49_s21  }
  0x33   : > { %p1808_p2 = pnand %p1821_p7, %p2283_p5  ;;  %s283_s5 = scalar_lea.hbm %s2439_s0, %s1353_s3 }
  0x34   : > { %s284_s26 = sshll.u32 %s283_s5, 4  ;;  %s272_s1 = scalar_lea.sflag [#allocation3], %s271_s20  ;;  %s285_s26 = int_to_ptr.hbm [resolvable:$true] %s284_s26 }
  0x35   : > { %s2126_s30 = smov 128   ;;  %s2127_s12 = smov 8  }
  0x36   : > { %1810 = dma.hbm_to_vmem [thread:$0]  (!%p1808_p2), %s285_s26, 512, %s287_s19, %s272_s1, %s2126_s30, %s2126_s30, %s2127_s12  }
  0x37   : > { %298 = sbr.rel (%p2242_p8) target bundleno = 315 (0x13b), region = 40  ;;  %s2308_s21 = sand.u32 (!%p2242_p8), 1, %s2093_s22  }
  0x38   : > { %s2311_s2 = sshll.u32 (!%p2242_p8), %s2308_s21, 5  ;;  %s301_s6 = scalar_lea.sflag (!%p2242_p8), [#allocation3], %s2308_s21 }
  0x39   : > { %s2315_s3 = scalar_lea.vmem (!%p2242_p8), [#allocation2], %s2311_s2 }
  0x3c   : > { %2068 = dma.done.wait (%p2229_p4), %s301_s6, 512  }
  0x3d   : > { %2070 = vsyncadd (%p2229_p4), %s301_s6, 4294966784 }
  0x3e   : > { %2072 = dma.done.wait (%p2219_p1), [#allocation6], 4128  }
  0x3f   : > { %2074 = vsyncadd (%p2219_p1), [#allocation6], 4294963168 }
  0x40   : > { %2076 = dma.done.wait (%p2219_p1), [#allocation9], 4096  }
  0x41   : > { %2078 = vsyncadd (%p2219_p1), [#allocation9], 4294963200  ;;  %v1664_v0 = vld [vmem:[#allocation5 + $0x38] sm:$0xff]  ;;  %v1663_v4 = vld [vmem:[#allocation5 + $0x30] sm:$0xff]  ;;  %s2353_s7 = scalar_lea.vmem [#allocation10], %s2311_s2  ;;  %s2357_s9 = scalar_lea.vmem [#allocation11], %s2311_s2 }
  0x42   : > { %v1672_v1 = vld [vmem:[#allocation5 + $0x78] sm:$0xff]  ;;  %513 = vmatpush.bf16.msra.mxu0 %v1664_v0  ;;  %v1671_v5 = vld [vmem:[#allocation5 + $0x70] sm:$0xff]  ;;  %v1662_v8 = vld [vmem:[#allocation5 + $0x28] sm:$0xff]  ;;  %s1100_s20 = scalar_lea.sflag [#allocation4], %s2308_s21  ;;  %s1105_s29 = scalar_lea.sflag [#allocation12], %s2308_s21 }
  0x43   : > { %v1680_v2 = vld [vmem:[#allocation8 + $0x38] sm:$0xff]  ;;  %532 = vmatpush.bf16.msra.mxu1 %v1672_v1  ;;  %v1679_v6 = vld [vmem:[#allocation8 + $0x30] sm:$0xff]  ;;  %v1670_v9 = vld [vmem:[#allocation5 + $0x68] sm:$0xff] }
  0x44   : > { %v1688_v3 = vld [vmem:[#allocation8 + $0x78] sm:$0xff]  ;;  %683 = vmatpush.bf16.msra.mxu2 %v1680_v2  ;;  %v1687_v7 = vld [vmem:[#allocation8 + $0x70] sm:$0xff]  ;;  %v1678_v10 = vld [vmem:[#allocation8 + $0x28] sm:$0xff] }
  0x45   : > { %702 = vmatpush.bf16.msra.mxu3 %v1688_v3  ;;  %v1686_v11 = vld [vmem:[#allocation8 + $0x68] sm:$0xff]  ;;  %v1661_v12 = vld [vmem:[#allocation5 + $0x20] sm:$0xff]  ;;  %v1660_v16 = vld [vmem:[#allocation5 + $0x18] sm:$0xff] }
  0x46   : > { %514 = vmatpush.bf16.msra.mxu0 %v1663_v4  ;;  %v1669_v13 = vld [vmem:[#allocation5 + $0x60] sm:$0xff]  ;;  %v1668_v17 = vld [vmem:[#allocation5 + $0x58] sm:$0xff]  ;;  %v1659_v20 = vld [vmem:[#allocation5 + $0x10] sm:$0xff] }
  0x47   : > { %533 = vmatpush.bf16.msra.mxu1 %v1671_v5  ;;  %v1677_v14 = vld [vmem:[#allocation8 + $0x20] sm:$0xff]  ;;  %v1676_v18 = vld [vmem:[#allocation8 + $0x18] sm:$0xff]  ;;  %v1667_v21 = vld [vmem:[#allocation5 + $0x50] sm:$0xff] }
  0x48   : > { %684 = vmatpush.bf16.msra.mxu2 %v1679_v6  ;;  %v1685_v15 = vld [vmem:[#allocation8 + $0x60] sm:$0xff]  ;;  %v1684_v19 = vld [vmem:[#allocation8 + $0x58] sm:$0xff]  ;;  %v1675_v22 = vld [vmem:[#allocation8 + $0x10] sm:$0xff] }
  0x49   : > { %703 = vmatpush.bf16.msra.mxu3 %v1687_v7  ;;  %v1683_v23 = vld [vmem:[#allocation8 + $0x50] sm:$0xff]  ;;  %v1658_v24 = vld [vmem:[#allocation5 + $0x8] sm:$0xff]  ;;  %v1657_v28 = vld [vmem:[#allocation5] sm:$0xff] }
  0x4a   : > { %515 = vmatpush.bf16.msra.mxu0 %v1662_v8  ;;  %v1666_v25 = vld [vmem:[#allocation5 + $0x48] sm:$0xff]  ;;  %v1665_v29 = vld [vmem:[#allocation5 + $0x40] sm:$0xff]  ;;  %v1696_v37 = vld [vmem:[#allocation5 + $0xb8] sm:$0xff] }
  0x4b   : > { %534 = vmatpush.bf16.msra.mxu1 %v1670_v9  ;;  %v1674_v26 = vld [vmem:[#allocation8 + $0x8] sm:$0xff]  ;;  %v1363_v30 = vld [vmem:[%s2315_s3] sm:$0xf]  ;;  %v1653_v32 = vld [vmem:[%s2315_s3 + $0x4] sm:$0xf] }
  0x4c   : > { %685 = vmatpush.bf16.msra.mxu2 %v1678_v10  ;;  %v1682_v27 = vld [vmem:[#allocation8 + $0x48] sm:$0xff]  ;;  %v1673_v34 = vld [vmem:[#allocation8] sm:$0xff]  ;;  %v1712_v36 = vld [vmem:[#allocation8 + $0xb8] sm:$0xff] }
  0x4d   : > { %704 = vmatpush.bf16.msra.mxu3 %v1686_v11  ;;  %v1654_v31 = vld [vmem:[%s2315_s3 + $0x4] sm:$0xf0]  ;;  %v1365_v33 = vld [vmem:[%s2315_s3 + $0x8] sm:$0xf0]  ;;  %v1704_v40 = vld [vmem:[#allocation5 + $0xf8] sm:$0xff] }
  0x4e   : > { %516 = vmatpush.bf16.msra.mxu0 %v1661_v12  ;;  %v1681_v35 = vld [vmem:[#allocation8 + $0x40] sm:$0xff]  ;;  %v2333_v38 = vor.u32 %v1654_v31, %v1363_v30  ;;  %v2335_v39 = vor.u32 %v1653_v32, %v1365_v33  ;;  %v1720_v41 = vld [vmem:[#allocation8 + $0xf8] sm:$0xff]  ;;  %v1711_v42 = vld [vmem:[#allocation8 + $0xb0] sm:$0xff] }
  0x4f   : > { %535 = vmatpush.bf16.msra.mxu1 %v1669_v13  ;;  %v1695_v43 = vld [vmem:[#allocation5 + $0xb0] sm:$0xff]  ;;  %v1694_v47 = vld [vmem:[#allocation5 + $0xa8] sm:$0xff]  ;;  %v1693_v51 = vld [vmem:[#allocation5 + $0xa0] sm:$0xff] }
  0x50   : > { %686 = vmatpush.bf16.msra.mxu2 %v1677_v14  ;;  %v1703_v44 = vld [vmem:[#allocation5 + $0xf0] sm:$0xff]  ;;  %v1702_v48 = vld [vmem:[#allocation5 + $0xe8] sm:$0xff]  ;;  %v1656_v53 = vld [vmem:[%s2315_s3 + $0x14] sm:$0xf0] }
  0x51   : > { %705 = vmatpush.bf16.msra.mxu3 %v1685_v15  ;;  %v1719_v45 = vld [vmem:[#allocation8 + $0xf0] sm:$0xff]  ;;  %v1710_v46 = vld [vmem:[#allocation8 + $0xa8] sm:$0xff]  ;;  %v1709_v50 = vld [vmem:[#allocation8 + $0xa0] sm:$0xff] }
  0x52   : > { %517 = vmatpush.bf16.msra.mxu0 %v1660_v16  ;;  %v1718_v49 = vld [vmem:[#allocation8 + $0xe8] sm:$0xff]  ;;  %v1655_v54 = vld [vmem:[%s2315_s3 + $0x14] sm:$0xf]  ;;  %v1373_v55 = vld [vmem:[%s2315_s3 + $0x18] sm:$0xf0] }
  0x53   : > { %536 = vmatpush.bf16.msra.mxu1 %v1668_v17  ;;  %v1371_v52 = vld [vmem:[%s2315_s3 + $0x10] sm:$0xf]  ;;  %v1701_v56 = vld [vmem:[#allocation5 + $0xe0] sm:$0xff]  ;;  %v1692_v59 = vld [vmem:[#allocation5 + $0x98] sm:$0xff]  ;;  %v1376_v61 = vor.u32 %v1655_v54, %v1373_v55 }
  0x54   : > { %687 = vmatpush.bf16.msra.mxu2 %v1676_v18  ;;  %v1717_v57 = vld [vmem:[#allocation8 + $0xe0] sm:$0xff]  ;;  %v1708_v58 = vld [vmem:[#allocation8 + $0x98] sm:$0xff]  ;;  %v1372_v60 = vor.u32 %v1656_v53, %v1371_v52  ;;  %v1707_v0 = vld [vmem:[#allocation8 + $0x90] sm:$0xff] }
  0x55   : > { %706 = vmatpush.bf16.msra.mxu3 %v1684_v19  ;;  %v1700_v62 = vld [vmem:[#allocation5 + $0xd8] sm:$0xff]  ;;  %v1691_v1 = vld [vmem:[#allocation5 + $0x90] sm:$0xff]  ;;  %v1690_v5 = vld [vmem:[#allocation5 + $0x88] sm:$0xff] }
  0x56   : > { %518 = vmatpush.bf16.msra.mxu0 %v1659_v20  ;;  %v1716_v63 = vld [vmem:[#allocation8 + $0xd8] sm:$0xff]  ;;  %v1699_v2 = vld [vmem:[#allocation5 + $0xd0] sm:$0xff]  ;;  %v1698_v6 = vld [vmem:[#allocation5 + $0xc8] sm:$0xff] }
  0x57   : > { %537 = vmatpush.bf16.msra.mxu1 %v1667_v21  ;;  %v1715_v3 = vld [vmem:[#allocation8 + $0xd0] sm:$0xff]  ;;  %v1706_v4 = vld [vmem:[#allocation8 + $0x88] sm:$0xff]  ;;  %v1705_v8 = vld [vmem:[#allocation8 + $0x80] sm:$0xff] }
  0x58   : > { %688 = vmatpush.bf16.msra.mxu2 %v1675_v22  ;;  %v1714_v7 = vld [vmem:[#allocation8 + $0xc8] sm:$0xff]  ;;  %v1689_v9 = vld [vmem:[#allocation5 + $0x80] sm:$0xff] }
  0x59   : > { %707 = vmatpush.bf16.msra.mxu3 %v1683_v23  ;;  %v1697_v10 = vld [vmem:[#allocation5 + $0xc0] sm:$0xff] }
  0x5a   : > { %519 = vmatpush.bf16.msra.mxu0 %v1658_v24  ;;  %v1713_v11 = vld [vmem:[#allocation8 + $0xc0] sm:$0xff]  ;;  %v1911_v14 = vld [vmem:[#allocation7] ss:$0 sm:$0xff] }
  0x5b   : > { %538 = vmatpush.bf16.msra.mxu1 %v1666_v25  ;;  %v1912_v21 = vld [vmem:[%s2443_s4] ss:$0 sm:$0xff] }
  0x5c   : > { %689 = vmatpush.bf16.msra.mxu2 %v1674_v26 }
  0x5d   : > { %708 = vmatpush.bf16.msra.mxu3 %v1682_v27 }
  0x5e   : > { %520 = vmatpush.bf16.msra.mxu0 %v1657_v28 }
  0x5f   : > { %539 = vmatpush.bf16.msra.mxu1 %v1665_v29 }
  0x60   : > { %690 = vmatpush.bf16.msra.mxu2 %v1673_v34 }
  0x61   : > { %709 = vmatpush.bf16.msra.mxu3 %v1681_v35  ;;  %521 = vmatmul.bf16.vlgmr.msra.gmra.mxu0 %v2333_v38 }
  0x62   : > { %871 = vmatpush.bf16.msrb.mxu0 %v1696_v37  ;;  %540 = vmatmul.bf16.vlgmr.msra.gmra.mxu1 %v2335_v39 }
  0x63   : > { %691 = vmatmul.bf16.vlgmr.msra.gmra.mxu2 %v2333_v38  ;;  %890 = vmatpush.bf16.msrb.mxu1 %v1704_v40 }
  0x64   : > { %1043 = vmatpush.bf16.msrb.mxu2 %v1712_v36  ;;  %710 = vmatmul.bf16.vlgmr.msra.gmra.mxu3 %v2335_v39 }
  0x65   : > { %1062 = vmatpush.bf16.msrb.mxu3 %v1720_v41 }
  0x66   : > { %872 = vmatpush.bf16.msrb.mxu0 %v1695_v43 }
  0x67   : > { %891 = vmatpush.bf16.msrb.mxu1 %v1703_v44 }
  0x68   : > { %1044 = vmatpush.bf16.msrb.mxu2 %v1711_v42 }
  0x69   : > { %1063 = vmatpush.bf16.msrb.mxu3 %v1719_v45 }
  0x6a   : > { %873 = vmatpush.bf16.msrb.mxu0 %v1694_v47 }
  0x6b   : > { %892 = vmatpush.bf16.msrb.mxu1 %v1702_v48 }
  0x6c   : > { %1045 = vmatpush.bf16.msrb.mxu2 %v1710_v46 }
  0x6d   : > { %1064 = vmatpush.bf16.msrb.mxu3 %v1718_v49 }
  0x6e   : > { %874 = vmatpush.bf16.msrb.mxu0 %v1693_v51  ;;  %v1913_v51 = vld [vmem:[#allocation7 + $0x1] ss:$0 sm:$0xff] }
  0x6f   : > { %893 = vmatpush.bf16.msrb.mxu1 %v1701_v56 }
  0x70   : > { %1046 = vmatpush.bf16.msrb.mxu2 %v1709_v50 }
  0x71   : > { %1065 = vmatpush.bf16.msrb.mxu3 %v1717_v57  ;;  %526 = vmatmul.bf16.gmra.mxu0 %v1372_v60 }
  0x72   : > { %875 = vmatpush.bf16.msrb.mxu0 %v1692_v59  ;;  %545 = vmatmul.bf16.gmra.mxu1 %v1376_v61  ;;  %v1914_v59 = vld [vmem:[%s2443_s4 + $0x1] ss:$0 sm:$0xff] }
  0x73   : > { %696 = vmatmul.bf16.gmra.mxu2 %v1372_v60  ;;  %894 = vmatpush.bf16.msrb.mxu1 %v1700_v62 }
  0x74   : > { %1047 = vmatpush.bf16.msrb.mxu2 %v1708_v58  ;;  %715 = vmatmul.bf16.gmra.mxu3 %v1376_v61 }
  0x75   : > { %1066 = vmatpush.bf16.msrb.mxu3 %v1716_v63 }
  0x76   : > { %876 = vmatpush.bf16.msrb.mxu0 %v1691_v1 }
  0x77   : > { %895 = vmatpush.bf16.msrb.mxu1 %v1699_v2 }
  0x78   : > { %1048 = vmatpush.bf16.msrb.mxu2 %v1707_v0 }
  0x79   : > { %1067 = vmatpush.bf16.msrb.mxu3 %v1715_v3 }
  0x7a   : > { %877 = vmatpush.bf16.msrb.mxu0 %v1690_v5 }
  0x7b   : > { %896 = vmatpush.bf16.msrb.mxu1 %v1698_v6 }
  0x7c   : > { %1049 = vmatpush.bf16.msrb.mxu2 %v1706_v4 }
  0x7d   : > { %1068 = vmatpush.bf16.msrb.mxu3 %v1714_v7 }
  0x7e   : > { %878 = vmatpush.bf16.msrb.mxu0 %v1689_v9 }
  0x7f   : > { %897 = vmatpush.bf16.msrb.mxu1 %v1697_v10 }
  0x80   : > { %1050 = vmatpush.bf16.msrb.mxu2 %v1705_v8 }
  0x81   : > { %1069 = vmatpush.bf16.msrb.mxu3 %v1713_v11  ;;  %879 = vmatmul.bf16.vlgmr.msrb.gmra.mxu0 %v2333_v38 }
  0x82   : > { %898 = vmatmul.bf16.vlgmr.msrb.gmra.mxu1 %v2335_v39 }
  0x83   : > { %1051 = vmatmul.bf16.vlgmr.msrb.gmra.mxu2 %v2333_v38 }
  0x84   : > { %1070 = vmatmul.bf16.vlgmr.msrb.gmra.mxu3 %v2335_v39 }
  0x91   : > { %884 = vmatmul.bf16.gmra.mxu0 %v1372_v60 }
  0x92   : > { %903 = vmatmul.bf16.gmra.mxu1 %v1376_v61 }
  0x93   : > { %1056 = vmatmul.bf16.gmra.mxu2 %v1372_v60 }
  0x94   : > { %1075 = vmatmul.bf16.gmra.mxu3 %v1376_v61 }
  0xde   : > { %v522_v12 = vpop.f32.mrf.mxu0 }
  0xdf   : > { %v541_v13 = vpop.f32.mrf.mxu1  ;;  %v523_v15 = vadd.f32 %v1911_v14, %v522_v12 }
  0xe1   : > { %v542_v22 = vadd.f32 %v541_v13, %v523_v15 }
  0xe6   : > { %v692_v16 = vpop.f32.mrf.mxu2  ;;  %v524_v18 = vpop.f32.mrf.mxu0 }
  0xe7   : > { %v711_v17 = vpop.f32.mrf.mxu3  ;;  %v543_v19 = vpop.f32.mrf.mxu1  ;;  %v525_v20 = vadd.f32 %v1911_v14, %v524_v18  ;;  %v693_v25 = vadd.f32 %v1912_v21, %v692_v16 }
  0xe9   : > { %v544_v23 = vadd.f32 %v543_v19, %v525_v20  ;;  %v712_v31 = vadd.f32 %v711_v17, %v693_v25 }
  0xeb   : > { %v1724_v24 = vpack.c.bf16 %v544_v23, %v542_v22 }
  0xed   : > { %1725 = vst [vmem:[%s2353_s7] sm:$0xff] %v1724_v24  }
  0xee   : > { %v694_v26 = vpop.f32.mrf.mxu2  ;;  %v527_v29 = vpop.f32.mrf.mxu0 }
  0xef   : > { %v713_v27 = vpop.f32.mrf.mxu3  ;;  %v695_v28 = vadd.f32 %v1912_v21, %v694_v26  ;;  %v546_v30 = vpop.f32.mrf.mxu1  ;;  %v528_v34 = vadd.f32 %v1911_v14, %v527_v29 }
  0xf1   : > { %v714_v32 = vadd.f32 %v713_v27, %v695_v28  ;;  %v547_v40 = vadd.f32 %v546_v30, %v528_v34 }
  0xf3   : > { %v1734_v33 = vpack.c.bf16 %v714_v32, %v712_v31 }
  0xf5   : > { %1735 = vst [vmem:[%s2357_s9] sm:$0xff] %v1734_v33  }
  0xf6   : > { %v697_v35 = vpop.f32.mrf.mxu2  ;;  %v529_v37 = vpop.f32.mrf.mxu0 }
  0xf7   : > { %v716_v36 = vpop.f32.mrf.mxu3  ;;  %v548_v38 = vpop.f32.mrf.mxu1  ;;  %v530_v39 = vadd.f32 %v1911_v14, %v529_v37  ;;  %v698_v43 = vadd.f32 %v1912_v21, %v697_v35 }
  0xf9   : > { %v549_v41 = vadd.f32 %v548_v38, %v530_v39  ;;  %v717_v49 = vadd.f32 %v716_v36, %v698_v43 }
  0xfb   : > { %v1729_v42 = vpack.c.bf16 %v549_v41, %v547_v40 }
  0xfd   : > { %1761 = vst [vmem:[%s2353_s7 + $0x8] sm:$0xff] %v1729_v42  }
  0xfe   : > { %v699_v44 = vpop.f32.mrf.mxu2  ;;  %v880_v47 = vpop.f32.mrf.mxu0 }
  0xff   : > { %v718_v45 = vpop.f32.mrf.mxu3  ;;  %v700_v46 = vadd.f32 %v1912_v21, %v699_v44  ;;  %v899_v48 = vpop.f32.mrf.mxu1  ;;  %v881_v53 = vadd.f32 %v1913_v51, %v880_v47 }
 0x101   : > { %v719_v50 = vadd.f32 %v718_v45, %v700_v46  ;;  %v900_v60 = vadd.f32 %v899_v48, %v881_v53 }
 0x103   : > { %v1739_v52 = vpack.c.bf16 %v719_v50, %v717_v49 }
 0x105   : > { %1762 = vst [vmem:[%s2357_s9 + $0x8] sm:$0xff] %v1739_v52  }
 0x106   : > { %v1052_v54 = vpop.f32.mrf.mxu2  ;;  %v882_v56 = vpop.f32.mrf.mxu0 }
 0x107   : > { %v1071_v55 = vpop.f32.mrf.mxu3  ;;  %v883_v57 = vadd.f32 %v1913_v51, %v882_v56  ;;  %v901_v58 = vpop.f32.mrf.mxu1  ;;  %v1053_v63 = vadd.f32 %v1914_v59, %v1052_v54 }
 0x109   : > { %v902_v61 = vadd.f32 %v901_v58, %v883_v57  ;;  %v1072_v5 = vadd.f32 %v1071_v55, %v1053_v63 }
 0x10b   : > { %v1744_v62 = vpack.c.bf16 %v902_v61, %v900_v60 }
 0x10d   : > { %1763 = vst [vmem:[%s2353_s7 + $0x10] sm:$0xff] %v1744_v62  }
 0x10e   : > { %v1054_v0 = vpop.f32.mrf.mxu2  ;;  %v885_v3 = vpop.f32.mrf.mxu0 }
 0x10f   : > { %v1055_v1 = vadd.f32 %v1914_v59, %v1054_v0  ;;  %v1073_v2 = vpop.f32.mrf.mxu3  ;;  %v904_v4 = vpop.f32.mrf.mxu1  ;;  %v886_v8 = vadd.f32 %v1913_v51, %v885_v3 }
 0x111   : > { %v1074_v6 = vadd.f32 %v1073_v2, %v1055_v1  ;;  %v905_v14 = vadd.f32 %v904_v4, %v886_v8 }
 0x113   : > { %v1754_v7 = vpack.c.bf16 %v1074_v6, %v1072_v5 }
 0x115   : > { %1765 = vst [vmem:[%s2357_s9 + $0x10] sm:$0xff] %v1754_v7  }
 0x116   : > { %v1057_v9 = vpop.f32.mrf.mxu2  ;;  %v887_v11 = vpop.f32.mrf.mxu0 }
 0x117   : > { %v1076_v10 = vpop.f32.mrf.mxu3  ;;  %v888_v12 = vadd.f32 %v1913_v51, %v887_v11  ;;  %v906_v13 = vpop.f32.mrf.mxu1  ;;  %v1058_v17 = vadd.f32 %v1914_v59, %v1057_v9 }
 0x119   : > { %v907_v15 = vadd.f32 %v906_v13, %v888_v12  ;;  %v1077_v21 = vadd.f32 %v1076_v10, %v1058_v17 }
 0x11b   : > { %v1749_v16 = vpack.c.bf16 %v907_v15, %v905_v14 }
 0x11d   : > { %1764 = vst [vmem:[%s2353_s7 + $0x18] sm:$0xff] %v1749_v16  }
 0x11e   : > { %v1059_v18 = vpop.f32.mrf.mxu2 }
 0x11f   : > { %v1060_v19 = vadd.f32 %v1914_v59, %v1059_v18  ;;  %v1078_v20 = vpop.f32.mrf.mxu3 }
 0x121   : > { %v1079_v22 = vadd.f32 %v1078_v20, %v1060_v19 }
 0x123   : > { %v1759_v23 = vpack.c.bf16 %v1079_v22, %v1077_v21 }
 0x125   : > { %1766 = vst [vmem:[%s2357_s9 + $0x18] sm:$0xff] %v1759_v23  }
 0x126   : > { %s1644_s15 = sshll.u32 %s2101_s24, 2  ;;  %s1645_s8 = sshll.u32 %s2105_s25, 4 }
 0x127   : > { %s1116_s18 = sadd.s32 %s1645_s8, %s1644_s15  ;;  %s1129_s19 = sshll.u32 %s2353_s7, 4  ;;  %s1130_s19 = int_to_ptr.vmem [resolvable:$true] %s1129_s19 }
 0x128   : > { %s1646_s16 = sshll.u32 %s1116_s18, 2  ;;  %s2470_s12 = sld [smem:[#allocation29_spill]] }
 0x129   : > { %s2128_s3 = smov 256   ;;  %s2129_s5 = smov 512  }
 0x12a   : > { %1781 = sst [smem:[#allocation14]] (%p2279_p3), %s2128_s3  ;;  %s2130_s24 = smov 4  }
 0x12b   : > { %1782 = sst [smem:[#allocation14 + $0x1]] (%p2279_p3), %s2129_s5  ;;  %s2131_s25 = smov 64  }
 0x12c   : > { %1783 = sst [smem:[#allocation14 + $0x2]] (%p2279_p3), %s2130_s24  ;;  %s2132_s26 = smov [#allocation13]  }
 0x12d   : > { %1784 = sst [smem:[#allocation14 + $0x3]] (%p2279_p3), %s2131_s25  ;;  %s2133_s7 = smov 0  }
 0x12e   : > { %s1118_s2 = scalar_lea.hbm %s2470_s12, %s1646_s16  ;;  %1785 = sst [smem:[#allocation14 + $0x4]] (%p2279_p3), %s2131_s25 }
 0x12f   : > { %s1131_s6 = sshll.u32 %s1118_s2, 4  ;;  %1786 = sst [smem:[#allocation14 + $0x5]] (%p2279_p3), %s2130_s24  ;;  %s1132_s6 = int_to_ptr.hbm [resolvable:$true] %s1131_s6 }
 0x130   : > { %1787 = dma.general (%p2279_p3), %s1130_s19, 512, %s1132_s6, %s1100_s20, %s2132_s26, [#allocation14], %s2133_s7, 0  }
 0x131   : > { %s2471_s15 = sld [smem:[#allocation30_spill]]  ;;  %s1171_s18 = sshll.u32 %s2357_s9, 4  ;;  %s1172_s18 = int_to_ptr.vmem [resolvable:$true] %s1171_s18 }
 0x132   : > { %s2134_s30 = smov 256   ;;  %s2135_s20 = smov 512  }
 0x133   : > { %1788 = sst [smem:[#allocation16]] (%p2279_p3), %s2134_s30  ;;  %s2136_s19 = smov 4  }
 0x134   : > { %1789 = sst [smem:[#allocation16 + $0x1]] (%p2279_p3), %s2135_s20  ;;  %s2137_s12 = smov 64  }
 0x135   : > { %1790 = sst [smem:[#allocation16 + $0x2]] (%p2279_p3), %s2136_s19  ;;  %s2138_s9 = smov [#allocation15]  }
 0x136   : > { %1791 = sst [smem:[#allocation16 + $0x3]] (%p2279_p3), %s2137_s12 }
 0x137   : > { %s1160_s8 = scalar_lea.hbm %s2471_s15, %s1646_s16  ;;  %1792 = sst [smem:[#allocation16 + $0x4]] (%p2279_p3), %s2137_s12 }
 0x138   : > { %s1173_s1 = sshll.u32 %s1160_s8, 4  ;;  %1793 = sst [smem:[#allocation16 + $0x5]] (%p2279_p3), %s2136_s19  ;;  %s1174_s1 = int_to_ptr.hbm [resolvable:$true] %s1173_s1 }
 0x139   : > { %s2139_s16 = smov 0  }
 0x13a   : > { %1794 = dma.general (%p2279_p3), %s1172_s18, 512, %s1174_s1, %s1105_s29, %s2138_s9, [#allocation16], %s2139_s16, 0  }
 0x13b PF: > { %s2472_s2 = sld [smem:[#allocation22_spill]]  ;;  %p1825_p1 = scmp.ge.s32.totalorder %s2117_s28, 2 }
 0x13d   : > { %p1812_p4 = pnand %p1825_p1, %p2234_p6 }
 0x13f   : > { %p1813_p8 = pneg %p1812_p4 }
 0x141   : > { %s1201_s3 = sand.u32 1, %s2472_s2  }
 0x142   : > { %s1202_s5 = scalar_lea.sflag [#allocation4], %s1201_s3 }
 0x143   : > { %2080 = dma.done.wait (%p1813_p8), %s1202_s5, 512  }
 0x144   : > { %2082 = vsyncadd (%p1813_p8), %s1202_s5, 4294966784  ;;  %s1212_s24 = scalar_lea.sflag [#allocation12], %s1201_s3 }
 0x145   : > { %2084 = dma.done.wait (%p1813_p8), %s1212_s24, 512  }
 0x146   : > { %2086 = vsyncadd (%p1813_p8), %s1212_s24, 4294966784  ;;  %s28_s28 = sadd.s32 1, %s2117_s28   ;;  %s2474_s24 = sld [smem:[#allocation23_spill]] }
 0x147   : > { %p25_p10 = scmp.ge.s32.totalorder %s28_s28, 6   ;;  %s2475_s26 = sld [smem:[#allocation25_spill]] }
 0x148   : > { %s2476_s21 = smov %s2093_s22  ;;  %s2477_s22 = smov %s2097_s23 }
 0x149   : > { %s2478_s23 = smov %s2296_s13  ;;  %s2479_s25 = smov %s2113_s27 }
 0x14a   : > { %s2480_s27 = smov %s2486_s10  ;;  %27 = sbr.rel (!%p25_p10) target bundleno = 17 (0x11), region = 130 }
 0x14f   :  { %1218 = vsyncpa [#allocation3], 1 }
 0x150   :  { %1220 = vsyncpa [#allocation3 + $0x1], 1 }
 0x151   :  { %1221 = vsyncpa [#allocation6], 1 }
 0x152   :  { %1222 = vsyncpa [#allocation9], 1 }
 0x153   :  { %1223 = vsyncpa [#allocation4], 1 }
 0x154   :  { %1225 = vsyncpa [#allocation4 + $0x1], 1 }
 0x155   :  { %1226 = vsyncpa [#allocation12], 1 }
 0x156   :  { %1228 = vsyncpa [#allocation12 + $0x1], 1 }

</bundles_post_ra>
